<compile_context>
chip_gen: v7x
topology: tpu7x:2x2x1
jax: 0.10.0
libtpu: 0.0.40
codegen_flags: <defaults>
</compile_context>

<pallas_src>
import functools

import jax
import jax.numpy as jnp
from jax.experimental import pallas as pl
from jax.experimental.pallas import tpu as pltpu

# ---------------- configuration (small synthetic ViT-S/14 stand-in) ----------
PATCH = 14            # patch_size=14 from the module
EMB = 32              # emb_dim (small for test; module default 384)
HEADS = 2
DHEAD = EMB // HEADS
HD = HEADS * DHEAD    # fused head width (== EMB)
DEPTH = 4
SELECT_LIST = (1, 3)
N_SEL = len(SELECT_LIST)
NECK_DIM = 16
DEC_HIDDEN = 32
IMG_C = 3
LN_EPS = 1e-6         # DINOv2 layer norm eps

# dot_general dims for A @ B^T (contract last dim of both operands)
_CONTRACT_LAST = (((1,), (1,)), ((), ()))


# ---------------- shared helpers ---------------------------------------------
def _padded_hw(H, W):
    # Reproduces the reference module's exact padding formula: if either dim is
    # misaligned, BOTH dims get `PATCH - dim % PATCH` added.
    if H % PATCH != 0 or W % PATCH != 0:
        return PATCH - H % PATCH + H, PATCH - W % PATCH + W
    return H, W


def _ln(x, g, b):
    mu = jnp.mean(x, axis=-1, keepdims=True)
    var = jnp.mean(jnp.square(x - mu), axis=-1, keepdims=True)
    return (x - mu) * jax.lax.rsqrt(var + LN_EPS) * g + b


# ---------------- kernel 1: patch embedding (+ pos embed) ---------------------
def _patch_embed_kernel(p_ref, w_ref, b_ref, pos_ref, o_ref):
    y = jnp.dot(p_ref[...], w_ref[...], preferred_element_type=jnp.float32)
    o_ref[...] = (y + b_ref[...] + pos_ref[...]).astype(o_ref.dtype)


def patch_embed(patches, w, b, pos_patch):
    bsz, n_tok, cpp = patches.shape
    emb = w.shape[1]
    return pl.pallas_call(
        _patch_embed_kernel,
        out_shape=jax.ShapeDtypeStruct((bsz, n_tok, emb), jnp.float32),
        grid=(bsz,),
        in_specs=[
            pl.BlockSpec((None, n_tok, cpp), lambda i: (i, 0, 0)),
            pl.BlockSpec((cpp, emb), lambda i: (0, 0)),
            pl.BlockSpec((1, emb), lambda i: (0, 0)),
            pl.BlockSpec((n_tok, emb), lambda i: (0, 0)),
        ],
        out_specs=pl.BlockSpec((None, n_tok, emb), lambda i: (i, 0, 0)),
        compiler_params=pltpu.CompilerParams(dimension_semantics=("parallel",)),
    )(patches, w, b, pos_patch)


# ---------------- kernel 2: fused transformer backbone ------------------------
def _vit_blocks_kernel(x0_ref, ln1g_ref, ln1b_ref, qw_ref, qb_ref, kw_ref,
                       kb_ref, vw_ref, vb_ref, pw_ref, pb_ref, ln2g_ref,
                       ln2b_ref, f1w_ref, f1b_ref, f2w_ref, f2b_ref,
                       feat_ref, x_scr, *, heads, dhead, scale, select_list):
    layer = pl.program_id(1)

    @pl.when(layer == 0)
    def _():
        x_scr[...] = x0_ref[...]          # residual stream lives in VMEM scratch

    x = x_scr[...]

    # --- attention: ln1 -> fused lane-dense q/k/v -> per-head softmax -> fused proj
    h16 = _ln(x, ln1g_ref[...], ln1b_ref[...]).astype(jnp.bfloat16)
    q = jnp.dot(h16, qw_ref[...], preferred_element_type=jnp.float32) + qb_ref[...]
    k = jnp.dot(h16, kw_ref[...], preferred_element_type=jnp.float32) + kb_ref[...]
    v = jnp.dot(h16, vw_ref[...], preferred_element_type=jnp.float32) + vb_ref[...]
    q16, k16, v16 = (t.astype(jnp.bfloat16) for t in (q, k, v))

    # TODO(synk): at production T (~1370) tile the (T,T) score matrix over q-row
    # blocks with lax.fori_loop instead of materializing it whole per head.
    heads_out = []
    for hi in range(heads):                        # static unroll, static lane slices
        sl = slice(hi * dhead, (hi + 1) * dhead)
        s = jax.lax.dot_general(q16[:, sl], k16[:, sl], _CONTRACT_LAST,
                                preferred_element_type=jnp.float32) * scale
        s = s - jnp.max(s, axis=-1, keepdims=True)
        p = jnp.exp(s)
        p = p * pl.reciprocal(jnp.sum(p, axis=-1, keepdims=True), approx=True)
        heads_out.append(
            jnp.dot(p.astype(jnp.bfloat16), v16[:, sl],
                    preferred_element_type=jnp.float32).astype(jnp.bfloat16))
    o_cat = jnp.concatenate(heads_out, axis=-1)    # (T, HD)
    attn = jnp.dot(o_cat, pw_ref[...], preferred_element_type=jnp.float32) + pb_ref[...]
    x = x + attn

    # --- MLP: ln2 -> fc1 (gelu) -> fc2
    h2 = _ln(x, ln2g_ref[...], ln2b_ref[...]).astype(jnp.bfloat16)
    m = jnp.dot(h2, f1w_ref[...], preferred_element_type=jnp.float32) + f1b_ref[...]
    m = jax.nn.gelu(m).astype(jnp.bfloat16)
    m = jnp.dot(m, f2w_ref[...], preferred_element_type=jnp.float32) + f2b_ref[...]
    x = x + m

    x_scr[...] = x

    # TODO(synk): get_intermediate_layers(norm=True) final LayerNorm on the taps
    # is not modeled; taps are post-block activations.
    is_tap = functools.reduce(lambda a, b: a | b,
                              [layer == s for s in select_list])

    @pl.when(is_tap)
    def _():
        feat_ref[...] = x.astype(feat_ref.dtype)   # bf16, tap layers only


def vit_blocks(x0, p):
    bsz, T, emb = x0.shape
    scale = 1.0 / float(DHEAD) ** 0.5

    def xmap(bi, l): return (bi, 0, 0)
    def wmap(bi, l): return (l, 0, 0)

    def fmap(bi, l):
        # layer -> tap slot (slot changes only when passing a tap layer, so each
        # output block is written exactly once before it is written back).
        slot = 0
        for s in SELECT_LIST[:-1]:
            slot = slot + jnp.where(l > s, 1, 0)
        return (slot, bi, 0, 0)

    return pl.pallas_call(
        functools.partial(_vit_blocks_kernel, heads=HEADS, dhead=DHEAD,
                          scale=scale, select_list=SELECT_LIST),
        out_shape=jax.ShapeDtypeStruct((N_SEL, bsz, T, emb), jnp.bfloat16),
        grid=(bsz, DEPTH),
        in_specs=[
            pl.BlockSpec((None, T, emb), xmap),                 # x0
            pl.BlockSpec((None, 1, emb), wmap),                 # ln1_g
            pl.BlockSpec((None, 1, emb), wmap),                 # ln1_b
            pl.BlockSpec((None, emb, HD), wmap),                # q_w (fused heads)
            pl.BlockSpec((None, 1, HD), wmap),                  # q_b
            pl.BlockSpec((None, emb, HD), wmap),                # k_w
            pl.BlockSpec((None, 1, HD), wmap),                  # k_b
            pl.BlockSpec((None, emb, HD), wmap),                # v_w
            pl.BlockSpec((None, 1, HD), wmap),                  # v_b
            pl.BlockSpec((None, HD, emb), wmap),                # proj_w (fused)
            pl.BlockSpec((None, 1, emb), wmap),                 # proj_b
            pl.BlockSpec((None, 1, emb), wmap),                 # ln2_g
            pl.BlockSpec((None, 1, emb), wmap),                 # ln2_b
            pl.BlockSpec((None, emb, 4 * emb), wmap),           # fc1_w
            pl.BlockSpec((None, 1, 4 * emb), wmap),             # fc1_b
            pl.BlockSpec((None, 4 * emb, emb), wmap),           # fc2_w
            pl.BlockSpec((None, 1, emb), wmap),                 # fc2_b
        ],
        out_specs=pl.BlockSpec((None, None, T, emb), fmap),
        scratch_shapes=[pltpu.VMEM((T, emb), jnp.float32)],
        compiler_params=pltpu.CompilerParams(
            dimension_semantics=("parallel", "arbitrary")),
    )(x0, p["ln1_g"], p["ln1_b"], p["q_w"], p["q_b"], p["k_w"], p["k_b"],
      p["v_w"], p["v_b"], p["proj_w"], p["proj_b"], p["ln2_g"], p["ln2_b"],
      p["fc1_w"], p["fc1_b"], p["fc2_w"], p["fc2_b"])


# ---------------- kernel 3: fused neck + decoder (per patch-row pixel band) ---
def _neck_decoder_kernel(tap0_ref, tap1_ref, nw0_ref, nw1_ref, nb_ref,
                         w1n_ref, w1i_ref, b1_ref, w2c_ref, b2_ref,
                         up_ref, img_ref, o_ref):
    # neck (transposed): fb^T = gelu(W0^T t0^T + W1^T t1^T + b)   (NECK_DIM, gw)
    g = (jax.lax.dot_general(nw0_ref[...], tap0_ref[...], _CONTRACT_LAST,
                             preferred_element_type=jnp.float32)
         + jax.lax.dot_general(nw1_ref[...], tap1_ref[...], _CONTRACT_LAST,
                               preferred_element_type=jnp.float32)
         + nb_ref[...])
    fbT = jax.nn.gelu(g)
    # dec1 neck half; nearest-14x upsample within this band via a tiny column
    # selector (gw, 14*nw) -- row replication is implied by the band grid.
    gT = jnp.dot(w1n_ref[...], fbT.astype(jnp.bfloat16),
                 preferred_element_type=jnp.float32)                # (DH, gw)
    ncT = jnp.dot(gT.astype(jnp.bfloat16), up_ref[...],
                  preferred_element_type=jnp.float32)               # (DH, 14*nw)
    # dec1 image half ("concat" folded into a split dec1 weight)
    icT = jnp.dot(w1i_ref[...], img_ref[...],
                  preferred_element_type=jnp.float32)               # (DH, 14*nw)
    hT = jnp.maximum(ncT + icT + b1_ref[...], 0.0)
    # dec2 + sigmoid as VPU multiply + sublane reduce (M=1 matmul wastes the MXU)
    m = jnp.sum(w2c_ref[...] * hT, axis=0, keepdims=True) + b2_ref[...]
    o_ref[...] = jax.nn.sigmoid(m).astype(o_ref.dtype)


def neck_decoder(tap0, tap1, img_dec, upband, p):
    bsz, gh, gw, emb = tap0.shape
    pband = img_dec.shape[3]

    def bmap(bi, gi): return (bi, gi, 0, 0)
    def smap(bi, gi): return (0, 0)

    return pl.pallas_call(
        _neck_decoder_kernel,
        out_shape=jax.ShapeDtypeStruct((bsz, gh, 1, pband), jnp.float32),
        grid=(bsz, gh),
        in_specs=[
            pl.BlockSpec((None, None, gw, emb), bmap),          # tap0 band
            pl.BlockSpec((None, None, gw, emb), bmap),          # tap1 band
            pl.BlockSpec((NECK_DIM, emb), smap),                # neck_w0^T
            pl.BlockSpec((NECK_DIM, emb), smap),                # neck_w1^T
            pl.BlockSpec((NECK_DIM, 1), smap),                  # neck_b^T
            pl.BlockSpec((DEC_HIDDEN, NECK_DIM), smap),         # dec1_wn^T
            pl.BlockSpec((DEC_HIDDEN, IMG_C), smap),            # dec1_wi^T
            pl.BlockSpec((DEC_HIDDEN, 1), smap),                # dec1_b
            pl.BlockSpec((DEC_HIDDEN, 1), smap),                # dec2_w (column)
            pl.BlockSpec((1, 1), smap),                         # dec2_b
            pl.BlockSpec((gw, pband), smap),                    # column upsample sel
            pl.BlockSpec((None, None, IMG_C, pband), bmap),     # image band (bf16)
        ],
        out_specs=pl.BlockSpec((None, None, 1, pband), bmap),
        compiler_params=pltpu.CompilerParams(
            dimension_semantics=("parallel", "arbitrary")),
    )(tap0, tap1, p["neck_w_t"][0], p["neck_w_t"][1], p["neck_b_t"],
      p["dec1_wn_t"], p["dec1_wi_t"], p["dec1_b"], p["dec2_w_c"], p["dec2_b"],
      upband, img_dec)


# ---------------- parameters ---------------------------------------------------
def init_params(key, num_patch_tokens):
    ks = iter(jax.random.split(key, 20))

    def w16(shape, scale=0.02):   # bf16 weights for MXU operands
        return (scale * jax.random.normal(next(ks), shape, jnp.float32)
                ).astype(jnp.bfloat16)

    def w32(shape, scale=0.02):
        return scale * jax.random.normal(next(ks), shape, jnp.float32)

    return {
        # patch embed
        "patch_w": w16((IMG_C * PATCH * PATCH, EMB)),
        "patch_b": jnp.zeros((1, EMB), jnp.float32),
        "cls": w32((1, 1, EMB)),
        "pos_cls": w32((1, 1, EMB)),
        "pos_patch": w32((num_patch_tokens, EMB)),
        # transformer blocks, stacked over depth; heads fused into the N axis
        "ln1_g": jnp.ones((DEPTH, 1, EMB), jnp.float32),
        "ln1_b": jnp.zeros((DEPTH, 1, EMB), jnp.float32),
        "q_w": w16((DEPTH, EMB, HD)),
        "q_b": jnp.zeros((DEPTH, 1, HD), jnp.float32),
        "k_w": w16((DEPTH, EMB, HD)),
        "k_b": jnp.zeros((DEPTH, 1, HD), jnp.float32),
        "v_w": w16((DEPTH, EMB, HD)),
        "v_b": jnp.zeros((DEPTH, 1, HD), jnp.float32),
        "proj_w": w16((DEPTH, HD, EMB)),
        "proj_b": jnp.zeros((DEPTH, 1, EMB), jnp.float32),
        "ln2_g": jnp.ones((DEPTH, 1, EMB), jnp.float32),
        "ln2_b": jnp.zeros((DEPTH, 1, EMB), jnp.float32),
        "fc1_w": w16((DEPTH, EMB, 4 * EMB)),
        "fc1_b": jnp.zeros((DEPTH, 1, 4 * EMB), jnp.float32),
        "fc2_w": w16((DEPTH, 4 * EMB, EMB)),
        "fc2_b": jnp.zeros((DEPTH, 1, EMB), jnp.float32),
        # neck (transposed, bf16 MXU operands)
        "neck_w_t": w16((N_SEL, NECK_DIM, EMB)),
        "neck_b_t": jnp.zeros((NECK_DIM, 1), jnp.float32),
        # decoder (transposed; dec1 split into neck / image parts)
        "dec1_wn_t": w16((DEC_HIDDEN, NECK_DIM)),
        "dec1_wi_t": w16((DEC_HIDDEN, IMG_C)),
        "dec1_b": jnp.zeros((DEC_HIDDEN, 1), jnp.float32),
        "dec2_w_c": w32((DEC_HIDDEN, 1)),      # column form for VPU reduce
        "dec2_b": jnp.zeros((1, 1), jnp.float32),
    }


# ---------------- forward pass -------------------------------------------------
def forward(params, images):
    """images: NCHW float32 (B, 3, H, W). Returns (B, 1, H, W) matte."""
    b, c, H, W = images.shape

    # --- preprocess_inputs: zero-pad (exact reference formula) ---
    nh, nw = _padded_hw(H, W)
    if (nh, nw) != (H, W):
        images_p = jnp.zeros((b, c, nh, nw), images.dtype).at[:, :, :H, :W].set(images)
    else:
        images_p = images
    gh, gw = nh // PATCH, nw // PATCH
    n_tok = gh * gw

    # --- patch embed (conv k=14 s=14 equivalent); bf16 cast rides the im2col copy
    patches = images_p.reshape(b, c, gh, PATCH, gw, PATCH)
    patches = patches.transpose(0, 2, 4, 1, 3, 5).reshape(
        b, n_tok, c * PATCH * PATCH).astype(jnp.bfloat16)
    tok = patch_embed(patches, params["patch_w"], params["patch_b"],
                      params["pos_patch"])                       # (b, n_tok, E) f32

    cls = jnp.broadcast_to(params["cls"] + params["pos_cls"], (b, 1, EMB))
    x0 = jnp.concatenate([cls, tok], axis=1)                     # (b, T, E)

    # --- fused backbone: all DEPTH blocks in one kernel; only taps hit HBM (bf16)
    feats = vit_blocks(x0, params)                               # (N_SEL, b, T, E)
    tap0 = feats[0, :, 1:, :].reshape(b, gh, gw, EMB)
    tap1 = feats[1, :, 1:, :].reshape(b, gh, gw, EMB)

    # --- fused neck + decoder over (batch, patch-row) pixel bands ---
    pband = PATCH * nw
    img_dec = images_p.reshape(b, c, gh, PATCH, nw).transpose(0, 2, 1, 3, 4)
    img_dec = img_dec.reshape(b, gh, c, pband).astype(jnp.bfloat16)
    # column-only nearest-14x selector (gw, 14*nw); replaces the old dense
    # (n_tok, nh*nw) selector that could not fit VMEM at real resolutions.
    col_of_p = jnp.broadcast_to((jnp.arange(nw) // PATCH)[None, :],
                                (PATCH, nw)).reshape(pband)
    upband = (jnp.arange(gw)[:, None] == col_of_p[None, :]).astype(jnp.bfloat16)

    matte = neck_decoder(tap0, tap1, img_dec, upband, params)    # (b, gh, 1, pband)
    out = matte.reshape(b, gh * PATCH, nw)[:, None, :, :]        # (b, 1, nh, nw)

    # --- crop back to original H, W ---
    return out[:, :, :H, :W]


# ---------------- main ---------------------------------------------------------
if __name__ == "__main__":
    B, C, H, W = 2, 3, 40, 40        # 40 % 14 != 0 -> exercises the padding path
    key = jax.random.PRNGKey(0)
    images = jax.random.uniform(key, (B, C, H, W), dtype=jnp.float32)

    nh, nw = _padded_hw(H, W)        # 42x42 -> 3x3 patch grid -> 9 patch tokens
    params = init_params(jax.random.PRNGKey(42),
                         num_patch_tokens=(nh // PATCH) * (nw // PATCH))

    out = jax.jit(forward)(params, images)
    out = jax.block_until_ready(out)
    assert out.shape == (B, 1, H, W), out.shape
    assert bool(jnp.all(jnp.isfinite(out)))
    print("KERNEL_OK")
</pallas_src>

<mosaic_0001>
module attributes {stable_mosaic.version = 11 : i64} {
  func.func @_patch_embed_kernel(%arg0: i32, %arg1: memref<1x9x588xbf16, #tpu.memory_space<vmem>>, %arg2: memref<588x32xbf16, #tpu.memory_space<vmem>>, %arg3: memref<1x32xf32, #tpu.memory_space<vmem>>, %arg4: memref<9x32xf32, #tpu.memory_space<vmem>>, %arg5: memref<1x9x32xf32, #tpu.memory_space<vmem>>) attributes {dimension_semantics = [#tpu.dimension_semantics<parallel>], iteration_bounds = array<i64: 2>, scalar_prefetch = 0 : i64, scratch_operands = 0 : i64, tpu.core_type = #tpu.core_type<tc>, window_params = [{transform_indices = @transform_0, window_bounds = array<i64: 1, 9, 588>}, {pipeline_mode = #tpu.pipeline_mode<synchronous>, transform_indices = @transform_1, window_bounds = array<i64: 588, 32>}, {pipeline_mode = #tpu.pipeline_mode<synchronous>, transform_indices = @transform_2, window_bounds = array<i64: 1, 32>}, {pipeline_mode = #tpu.pipeline_mode<synchronous>, transform_indices = @transform_3, window_bounds = array<i64: 9, 32>}, {transform_indices = @transform_4, window_bounds = array<i64: 1, 9, 32>}]} {
    %c0 = arith.constant 0 : index
    %c0_0 = arith.constant 0 : index
    %c0_1 = arith.constant 0 : index
    %0 = vector.load %arg1[%c0, %c0_0, %c0_1] : memref<1x9x588xbf16, #tpu.memory_space<vmem>>, vector<1x9x588xbf16>
    %1 = vector.shape_cast %0 : vector<1x9x588xbf16> to vector<9x588xbf16>
    %c0_2 = arith.constant 0 : index
    %c0_3 = arith.constant 0 : index
    %2 = vector.load %arg2[%c0_2, %c0_3] : memref<588x32xbf16, #tpu.memory_space<vmem>>, vector<588x32xbf16>
    %cst = arith.constant dense<0.000000e+00> : vector<9x32xf32>
    %3 = tpu.matmul %1, %2, %cst {dimension_numbers = #tpu.dot_dimension_numbers<[1], [0], [0], [1], [0, 0, 1, 1], [], []>} : vector<9x588xbf16>, vector<588x32xbf16>, vector<9x32xf32> -> vector<9x32xf32>
    %c0_4 = arith.constant 0 : index
    %c0_5 = arith.constant 0 : index
    %4 = vector.load %arg3[%c0_4, %c0_5] : memref<1x32xf32, #tpu.memory_space<vmem>>, vector<1x32xf32>
    %5 = vector.broadcast %4 : vector<1x32xf32> to vector<9x32xf32>
    %6 = arith.addf %3, %5 : vector<9x32xf32>
    %c0_6 = arith.constant 0 : index
    %c0_7 = arith.constant 0 : index
    %7 = vector.load %arg4[%c0_6, %c0_7] : memref<9x32xf32, #tpu.memory_space<vmem>>, vector<9x32xf32>
    %8 = arith.addf %6, %7 : vector<9x32xf32>
    %c0_8 = arith.constant 0 : index
    %c0_9 = arith.constant 0 : index
    %c0_10 = arith.constant 0 : index
    %9 = vector.load %arg5[%c0_8, %c0_9, %c0_10] : memref<1x9x32xf32, #tpu.memory_space<vmem>>, vector<1x9x32xf32>
    %10 = vector.shape_cast %9 : vector<1x9x32xf32> to vector<9x32xf32>
    %11 = vector.shape_cast %8 : vector<9x32xf32> to vector<1x9x32xf32>
    tpu.vector_store %arg5[%c0_8, %c0_9, %c0_10], %11 {strides = array<i32>} : memref<1x9x32xf32, #tpu.memory_space<vmem>>, vector<1x9x32xf32>,
    return
  }
  func.func @transform_0(%arg0: i32) -> (i32, i32, i32) {
    %c0_i32 = arith.constant 0 : i32
    %c0_i32_0 = arith.constant 0 : i32
    %c0_i32_1 = arith.constant 0 : i32
    return %arg0, %c0_i32, %c0_i32_0 : i32, i32, i32
  }
  func.func @transform_1(%arg0: i32) -> (i32, i32) {
    %c0_i32 = arith.constant 0 : i32
    %c0_i32_0 = arith.constant 0 : i32
    %c0_i32_1 = arith.constant 0 : i32
    return %c0_i32, %c0_i32_0 : i32, i32
  }
  func.func @transform_2(%arg0: i32) -> (i32, i32) {
    %c0_i32 = arith.constant 0 : i32
    %c0_i32_0 = arith.constant 0 : i32
    %c0_i32_1 = arith.constant 0 : i32
    return %c0_i32, %c0_i32_0 : i32, i32
  }
  func.func @transform_3(%arg0: i32) -> (i32, i32) {
    %c0_i32 = arith.constant 0 : i32
    %c0_i32_0 = arith.constant 0 : i32
    %c0_i32_1 = arith.constant 0 : i32
    return %c0_i32, %c0_i32_0 : i32, i32
  }
  func.func @transform_4(%arg0: i32) -> (i32, i32, i32) {
    %c0_i32 = arith.constant 0 : i32
    %c0_i32_0 = arith.constant 0 : i32
    %c0_i32_1 = arith.constant 0 : i32
    return %arg0, %c0_i32, %c0_i32_0 : i32, i32, i32
  }
}

module attributes {stable_mosaic.version = 11 : i64} {
  func.func @_vit_blocks_kernel(%arg0: i32, %arg1: i32, %arg2: memref<1x10x32xf32, #tpu.memory_space<vmem>>, %arg3: memref<1x1x32xf32, #tpu.memory_space<vmem>>, %arg4: memref<1x1x32xf32, #tpu.memory_space<vmem>>, %arg5: memref<1x32x32xbf16, #tpu.memory_space<vmem>>, %arg6: memref<1x1x32xf32, #tpu.memory_space<vmem>>, %arg7: memref<1x32x32xbf16, #tpu.memory_space<vmem>>, %arg8: memref<1x1x32xf32, #tpu.memory_space<vmem>>, %arg9: memref<1x32x32xbf16, #tpu.memory_space<vmem>>, %arg10: memref<1x1x32xf32, #tpu.memory_space<vmem>>, %arg11: memref<1x32x32xbf16, #tpu.memory_space<vmem>>, %arg12: memref<1x1x32xf32, #tpu.memory_space<vmem>>, %arg13: memref<1x1x32xf32, #tpu.memory_space<vmem>>, %arg14: memref<1x1x32xf32, #tpu.memory_space<vmem>>, %arg15: memref<1x32x128xbf16, #tpu.memory_space<vmem>>, %arg16: memref<1x1x128xf32, #tpu.memory_space<vmem>>, %arg17: memref<1x128x32xbf16, #tpu.memory_space<vmem>>, %arg18: memref<1x1x32xf32, #tpu.memory_space<vmem>>, %arg19: memref<1x1x10x32xbf16, #tpu.memory_space<vmem>>, %arg20: memref<10x32xf32, #tpu.memory_space<vmem>>) attributes {dimension_semantics = [#tpu.dimension_semantics<parallel>, #tpu.dimension_semantics<arbitrary>], iteration_bounds = array<i64: 2, 4>, scalar_prefetch = 0 : i64, scratch_operands = 1 : i64, tpu.core_type = #tpu.core_type<tc>, window_params = [{transform_indices = @transform_0, window_bounds = array<i64: 1, 10, 32>}, {transform_indices = @transform_1, window_bounds = array<i64: 1, 1, 32>}, {transform_indices = @transform_2, window_bounds = array<i64: 1, 1, 32>}, {transform_indices = @transform_3, window_bounds = array<i64: 1, 32, 32>}, {transform_indices = @transform_4, window_bounds = array<i64: 1, 1, 32>}, {transform_indices = @transform_5, window_bounds = array<i64: 1, 32, 32>}, {transform_indices = @transform_6, window_bounds = array<i64: 1, 1, 32>}, {transform_indices = @transform_7, window_bounds = array<i64: 1, 32, 32>}, {transform_indices = @transform_8, window_bounds = array<i64: 1, 1, 32>}, {transform_indices = @transform_9, window_bounds = array<i64: 1, 32, 32>}, {transform_indices = @transform_10, window_bounds = array<i64: 1, 1, 32>}, {transform_indices = @transform_11, window_bounds = array<i64: 1, 1, 32>}, {transform_indices = @transform_12, window_bounds = array<i64: 1, 1, 32>}, {transform_indices = @transform_13, window_bounds = array<i64: 1, 32, 128>}, {transform_indices = @transform_14, window_bounds = array<i64: 1, 1, 128>}, {transform_indices = @transform_15, window_bounds = array<i64: 1, 128, 32>}, {transform_indices = @transform_16, window_bounds = array<i64: 1, 1, 32>}, {transform_indices = @transform_17, window_bounds = array<i64: 1, 1, 10, 32>}]} {
    %c0_i32 = arith.constant 0 : i32
    %0 = arith.cmpi eq, %arg1, %c0_i32 : i32
    %1 = arith.extui %0 : i1 to i32
    %c0_i32_0 = arith.constant 0 : i32
    %2 = arith.cmpi ne, %1, %c0_i32_0 : i32
    scf.if %2 {
      %c0_82 = arith.constant 0 : index
      %c0_83 = arith.constant 0 : index
      %c0_84 = arith.constant 0 : index
      %164 = vector.load %arg2[%c0_82, %c0_83, %c0_84] : memref<1x10x32xf32, #tpu.memory_space<vmem>>, vector<1x10x32xf32>
      %165 = vector.shape_cast %164 : vector<1x10x32xf32> to vector<10x32xf32>
      %c0_85 = arith.constant 0 : index
      %c0_86 = arith.constant 0 : index
      %166 = vector.load %arg20[%c0_85, %c0_86] : memref<10x32xf32, #tpu.memory_space<vmem>>, vector<10x32xf32>
      tpu.vector_store %arg20[%c0_85, %c0_86], %165 {strides = array<i32>} : memref<10x32xf32, #tpu.memory_space<vmem>>, vector<10x32xf32>,
    } else {
    }
    %c0 = arith.constant 0 : index
    %c0_1 = arith.constant 0 : index
    %3 = vector.load %arg20[%c0, %c0_1] : memref<10x32xf32, #tpu.memory_space<vmem>>, vector<10x32xf32>
    %c0_2 = arith.constant 0 : index
    %c0_3 = arith.constant 0 : index
    %c0_4 = arith.constant 0 : index
    %4 = vector.load %arg3[%c0_2, %c0_3, %c0_4] : memref<1x1x32xf32, #tpu.memory_space<vmem>>, vector<1x1x32xf32>
    %5 = vector.shape_cast %4 : vector<1x1x32xf32> to vector<1x32xf32>
    %c0_5 = arith.constant 0 : index
    %c0_6 = arith.constant 0 : index
    %c0_7 = arith.constant 0 : index
    %6 = vector.load %arg4[%c0_5, %c0_6, %c0_7] : memref<1x1x32xf32, #tpu.memory_space<vmem>>, vector<1x1x32xf32>
    %7 = vector.shape_cast %6 : vector<1x1x32xf32> to vector<1x32xf32>
    %cst = arith.constant dense<0.000000e+00> : vector<10xf32>
    %8 = vector.multi_reduction <add>, %3, %cst [1] : vector<10x32xf32> to vector<10xf32>
    %9 = vector.shape_cast %8 : vector<10xf32> to vector<10x1xf32>
    %cst_8 = arith.constant 3.200000e+01 : f32
    %10 = vector.broadcast %cst_8 : f32 to vector<10x1xf32>
    %11 = arith.divf %9, %10 : vector<10x1xf32>
    %12 = vector.broadcast %11 : vector<10x1xf32> to vector<10x32xf32>
    %13 = arith.subf %3, %12 : vector<10x32xf32>
    %14 = arith.mulf %13, %13 : vector<10x32xf32>
    %cst_9 = arith.constant dense<0.000000e+00> : vector<10xf32>
    %15 = vector.multi_reduction <add>, %14, %cst_9 [1] : vector<10x32xf32> to vector<10xf32>
    %16 = vector.shape_cast %15 : vector<10xf32> to vector<10x1xf32>
    %cst_10 = arith.constant 3.200000e+01 : f32
    %17 = vector.broadcast %cst_10 : f32 to vector<10x1xf32>
    %18 = arith.divf %16, %17 : vector<10x1xf32>
    %19 = vector.broadcast %11 : vector<10x1xf32> to vector<10x32xf32>
    %20 = arith.subf %3, %19 : vector<10x32xf32>
    %cst_11 = arith.constant 9.99999997E-7 : f32
    %21 = vector.broadcast %cst_11 : f32 to vector<10x1xf32>
    %22 = arith.addf %18, %21 : vector<10x1xf32>
    %23 = math.rsqrt %22 : vector<10x1xf32>
    %24 = vector.broadcast %23 : vector<10x1xf32> to vector<10x32xf32>
    %25 = arith.mulf %20, %24 : vector<10x32xf32>
    %26 = vector.broadcast %5 : vector<1x32xf32> to vector<10x32xf32>
    %27 = arith.mulf %25, %26 : vector<10x32xf32>
    %28 = vector.broadcast %7 : vector<1x32xf32> to vector<10x32xf32>
    %29 = arith.addf %27, %28 : vector<10x32xf32>
    %30 = arith.truncf %29 : vector<10x32xf32> to vector<10x32xbf16>
    %c0_12 = arith.constant 0 : index
    %c0_13 = arith.constant 0 : index
    %c0_14 = arith.constant 0 : index
    %31 = vector.load %arg5[%c0_12, %c0_13, %c0_14] : memref<1x32x32xbf16, #tpu.memory_space<vmem>>, vector<1x32x32xbf16>
    %32 = vector.shape_cast %31 : vector<1x32x32xbf16> to vector<32x32xbf16>
    %cst_15 = arith.constant dense<0.000000e+00> : vector<10x32xf32>
    %33 = tpu.matmul %30, %32, %cst_15 {dimension_numbers = #tpu.dot_dimension_numbers<[1], [0], [0], [1], [0, 0, 1, 1], [], []>} : vector<10x32xbf16>, vector<32x32xbf16>, vector<10x32xf32> -> vector<10x32xf32>
    %c0_16 = arith.constant 0 : index
    %c0_17 = arith.constant 0 : index
    %c0_18 = arith.constant 0 : index
    %34 = vector.load %arg6[%c0_16, %c0_17, %c0_18] : memref<1x1x32xf32, #tpu.memory_space<vmem>>, vector<1x1x32xf32>
    %35 = vector.shape_cast %34 : vector<1x1x32xf32> to vector<1x32xf32>
    %36 = vector.broadcast %35 : vector<1x32xf32> to vector<10x32xf32>
    %37 = arith.addf %33, %36 : vector<10x32xf32>
    %c0_19 = arith.constant 0 : index
    %c0_20 = arith.constant 0 : index
    %c0_21 = arith.constant 0 : index
    %38 = vector.load %arg7[%c0_19, %c0_20, %c0_21] : memref<1x32x32xbf16, #tpu.memory_space<vmem>>, vector<1x32x32xbf16>
    %39 = vector.shape_cast %38 : vector<1x32x32xbf16> to vector<32x32xbf16>
    %cst_22 = arith.constant dense<0.000000e+00> : vector<10x32xf32>
    %40 = tpu.matmul %30, %39, %cst_22 {dimension_numbers = #tpu.dot_dimension_numbers<[1], [0], [0], [1], [0, 0, 1, 1], [], []>} : vector<10x32xbf16>, vector<32x32xbf16>, vector<10x32xf32> -> vector<10x32xf32>
    %c0_23 = arith.constant 0 : index
    %c0_24 = arith.constant 0 : index
    %c0_25 = arith.constant 0 : index
    %41 = vector.load %arg8[%c0_23, %c0_24, %c0_25] : memref<1x1x32xf32, #tpu.memory_space<vmem>>, vector<1x1x32xf32>
    %42 = vector.shape_cast %41 : vector<1x1x32xf32> to vector<1x32xf32>
    %43 = vector.broadcast %42 : vector<1x32xf32> to vector<10x32xf32>
    %44 = arith.addf %40, %43 : vector<10x32xf32>
    %c0_26 = arith.constant 0 : index
    %c0_27 = arith.constant 0 : index
    %c0_28 = arith.constant 0 : index
    %45 = vector.load %arg9[%c0_26, %c0_27, %c0_28] : memref<1x32x32xbf16, #tpu.memory_space<vmem>>, vector<1x32x32xbf16>
    %46 = vector.shape_cast %45 : vector<1x32x32xbf16> to vector<32x32xbf16>
    %cst_29 = arith.constant dense<0.000000e+00> : vector<10x32xf32>
    %47 = tpu.matmul %30, %46, %cst_29 {dimension_numbers = #tpu.dot_dimension_numbers<[1], [0], [0], [1], [0, 0, 1, 1], [], []>} : vector<10x32xbf16>, vector<32x32xbf16>, vector<10x32xf32> -> vector<10x32xf32>
    %c0_30 = arith.constant 0 : index
    %c0_31 = arith.constant 0 : index
    %c0_32 = arith.constant 0 : index
    %48 = vector.load %arg10[%c0_30, %c0_31, %c0_32] : memref<1x1x32xf32, #tpu.memory_space<vmem>>, vector<1x1x32xf32>
    %49 = vector.shape_cast %48 : vector<1x1x32xf32> to vector<1x32xf32>
    %50 = vector.broadcast %49 : vector<1x32xf32> to vector<10x32xf32>
    %51 = arith.addf %47, %50 : vector<10x32xf32>
    %52 = arith.truncf %37 : vector<10x32xf32> to vector<10x32xbf16>
    %53 = arith.truncf %44 : vector<10x32xf32> to vector<10x32xbf16>
    %54 = arith.truncf %51 : vector<10x32xf32> to vector<10x32xbf16>
    %55 = vector.extract_strided_slice %52 {offsets = [0, 0], sizes = [10, 16], strides = [1, 1]} : vector<10x32xbf16> to vector<10x16xbf16>
    %56 = vector.extract_strided_slice %53 {offsets = [0, 0], sizes = [10, 16], strides = [1, 1]} : vector<10x32xbf16> to vector<10x16xbf16>
    %cst_33 = arith.constant dense<0.000000e+00> : vector<10x10xf32>
    %57 = tpu.matmul %55, %56, %cst_33 {dimension_numbers = #tpu.dot_dimension_numbers<[1], [1], [0], [0], [0, 0, 1, 0], [], []>} : vector<10x16xbf16>, vector<10x16xbf16>, vector<10x10xf32> -> vector<10x10xf32>
    %cst_34 = arith.constant 2.500000e-01 : f32
    %58 = vector.broadcast %cst_34 : f32 to vector<10x10xf32>
    %59 = arith.mulf %57, %58 : vector<10x10xf32>
    %cst_35 = arith.constant dense<0xFF800000> : vector<10xf32>
    %60 = vector.multi_reduction <maximumf>, %59, %cst_35 [1] : vector<10x10xf32> to vector<10xf32>
    %61 = vector.shape_cast %60 : vector<10xf32> to vector<10x1xf32>
    %62 = vector.broadcast %61 : vector<10x1xf32> to vector<10x10xf32>
    %63 = arith.subf %59, %62 : vector<10x10xf32>
    %64 = math.exp %63 : vector<10x10xf32>
    %cst_36 = arith.constant dense<0.000000e+00> : vector<10xf32>
    %65 = vector.multi_reduction <add>, %64, %cst_36 [1] : vector<10x10xf32> to vector<10xf32>
    %66 = vector.shape_cast %65 : vector<10xf32> to vector<10x1xf32>
    %67 = tpu.reciprocal %66 {approx = true} : vector<10x1xf32> -> vector<10x1xf32>
    %68 = vector.broadcast %67 : vector<10x1xf32> to vector<10x10xf32>
    %69 = arith.mulf %64, %68 : vector<10x10xf32>
    %70 = arith.truncf %69 : vector<10x10xf32> to vector<10x10xbf16>
    %71 = vector.extract_strided_slice %54 {offsets = [0, 0], sizes = [10, 16], strides = [1, 1]} : vector<10x32xbf16> to vector<10x16xbf16>
    %cst_37 = arith.constant dense<0.000000e+00> : vector<10x16xf32>
    %72 = tpu.matmul %70, %71, %cst_37 {dimension_numbers = #tpu.dot_dimension_numbers<[1], [0], [0], [1], [0, 0, 1, 1], [], []>} : vector<10x10xbf16>, vector<10x16xbf16>, vector<10x16xf32> -> vector<10x16xf32>
    %73 = arith.truncf %72 : vector<10x16xf32> to vector<10x16xbf16>
    %74 = vector.extract_strided_slice %52 {offsets = [0, 16], sizes = [10, 16], strides = [1, 1]} : vector<10x32xbf16> to vector<10x16xbf16>
    %75 = vector.extract_strided_slice %53 {offsets = [0, 16], sizes = [10, 16], strides = [1, 1]} : vector<10x32xbf16> to vector<10x16xbf16>
    %cst_38 = arith.constant dense<0.000000e+00> : vector<10x10xf32>
    %76 = tpu.matmul %74, %75, %cst_38 {dimension_numbers = #tpu.dot_dimension_numbers<[1], [1], [0], [0], [0, 0, 1, 0], [], []>} : vector<10x16xbf16>, vector<10x16xbf16>, vector<10x10xf32> -> vector<10x10xf32>
    %cst_39 = arith.constant 2.500000e-01 : f32
    %77 = vector.broadcast %cst_39 : f32 to vector<10x10xf32>
    %78 = arith.mulf %76, %77 : vector<10x10xf32>
    %cst_40 = arith.constant dense<0xFF800000> : vector<10xf32>
    %79 = vector.multi_reduction <maximumf>, %78, %cst_40 [1] : vector<10x10xf32> to vector<10xf32>
    %80 = vector.shape_cast %79 : vector<10xf32> to vector<10x1xf32>
    %81 = vector.broadcast %80 : vector<10x1xf32> to vector<10x10xf32>
    %82 = arith.subf %78, %81 : vector<10x10xf32>
    %83 = math.exp %82 : vector<10x10xf32>
    %cst_41 = arith.constant dense<0.000000e+00> : vector<10xf32>
    %84 = vector.multi_reduction <add>, %83, %cst_41 [1] : vector<10x10xf32> to vector<10xf32>
    %85 = vector.shape_cast %84 : vector<10xf32> to vector<10x1xf32>
    %86 = tpu.reciprocal %85 {approx = true} : vector<10x1xf32> -> vector<10x1xf32>
    %87 = vector.broadcast %86 : vector<10x1xf32> to vector<10x10xf32>
    %88 = arith.mulf %83, %87 : vector<10x10xf32>
    %89 = arith.truncf %88 : vector<10x10xf32> to vector<10x10xbf16>
    %90 = vector.extract_strided_slice %54 {offsets = [0, 16], sizes = [10, 16], strides = [1, 1]} : vector<10x32xbf16> to vector<10x16xbf16>
    %cst_42 = arith.constant dense<0.000000e+00> : vector<10x16xf32>
    %91 = tpu.matmul %89, %90, %cst_42 {dimension_numbers = #tpu.dot_dimension_numbers<[1], [0], [0], [1], [0, 0, 1, 1], [], []>} : vector<10x10xbf16>, vector<10x16xbf16>, vector<10x16xf32> -> vector<10x16xf32>
    %92 = arith.truncf %91 : vector<10x16xf32> to vector<10x16xbf16>
    %93 = tpu.concatenate %73, %92 in 1 : vector<10x16xbf16>, vector<10x16xbf16> -> vector<10x32xbf16>
    %c0_43 = arith.constant 0 : index
    %c0_44 = arith.constant 0 : index
    %c0_45 = arith.constant 0 : index
    %94 = vector.load %arg11[%c0_43, %c0_44, %c0_45] : memref<1x32x32xbf16, #tpu.memory_space<vmem>>, vector<1x32x32xbf16>
    %95 = vector.shape_cast %94 : vector<1x32x32xbf16> to vector<32x32xbf16>
    %cst_46 = arith.constant dense<0.000000e+00> : vector<10x32xf32>
    %96 = tpu.matmul %93, %95, %cst_46 {dimension_numbers = #tpu.dot_dimension_numbers<[1], [0], [0], [1], [0, 0, 1, 1], [], []>} : vector<10x32xbf16>, vector<32x32xbf16>, vector<10x32xf32> -> vector<10x32xf32>
    %c0_47 = arith.constant 0 : index
    %c0_48 = arith.constant 0 : index
    %c0_49 = arith.constant 0 : index
    %97 = vector.load %arg12[%c0_47, %c0_48, %c0_49] : memref<1x1x32xf32, #tpu.memory_space<vmem>>, vector<1x1x32xf32>
    %98 = vector.shape_cast %97 : vector<1x1x32xf32> to vector<1x32xf32>
    %99 = vector.broadcast %98 : vector<1x32xf32> to vector<10x32xf32>
    %100 = arith.addf %96, %99 : vector<10x32xf32>
    %101 = arith.addf %3, %100 : vector<10x32xf32>
    %c0_50 = arith.constant 0 : index
    %c0_51 = arith.constant 0 : index
    %c0_52 = arith.constant 0 : index
    %102 = vector.load %arg13[%c0_50, %c0_51, %c0_52] : memref<1x1x32xf32, #tpu.memory_space<vmem>>, vector<1x1x32xf32>
    %103 = vector.shape_cast %102 : vector<1x1x32xf32> to vector<1x32xf32>
    %c0_53 = arith.constant 0 : index
    %c0_54 = arith.constant 0 : index
    %c0_55 = arith.constant 0 : index
    %104 = vector.load %arg14[%c0_53, %c0_54, %c0_55] : memref<1x1x32xf32, #tpu.memory_space<vmem>>, vector<1x1x32xf32>
    %105 = vector.shape_cast %104 : vector<1x1x32xf32> to vector<1x32xf32>
    %cst_56 = arith.constant dense<0.000000e+00> : vector<10xf32>
    %106 = vector.multi_reduction <add>, %101, %cst_56 [1] : vector<10x32xf32> to vector<10xf32>
    %107 = vector.shape_cast %106 : vector<10xf32> to vector<10x1xf32>
    %cst_57 = arith.constant 3.200000e+01 : f32
    %108 = vector.broadcast %cst_57 : f32 to vector<10x1xf32>
    %109 = arith.divf %107, %108 : vector<10x1xf32>
    %110 = vector.broadcast %109 : vector<10x1xf32> to vector<10x32xf32>
    %111 = arith.subf %101, %110 : vector<10x32xf32>
    %112 = arith.mulf %111, %111 : vector<10x32xf32>
    %cst_58 = arith.constant dense<0.000000e+00> : vector<10xf32>
    %113 = vector.multi_reduction <add>, %112, %cst_58 [1] : vector<10x32xf32> to vector<10xf32>
    %114 = vector.shape_cast %113 : vector<10xf32> to vector<10x1xf32>
    %cst_59 = arith.constant 3.200000e+01 : f32
    %115 = vector.broadcast %cst_59 : f32 to vector<10x1xf32>
    %116 = arith.divf %114, %115 : vector<10x1xf32>
    %117 = vector.broadcast %109 : vector<10x1xf32> to vector<10x32xf32>
    %118 = arith.subf %101, %117 : vector<10x32xf32>
    %cst_60 = arith.constant 9.99999997E-7 : f32
    %119 = vector.broadcast %cst_60 : f32 to vector<10x1xf32>
    %120 = arith.addf %116, %119 : vector<10x1xf32>
    %121 = math.rsqrt %120 : vector<10x1xf32>
    %122 = vector.broadcast %121 : vector<10x1xf32> to vector<10x32xf32>
    %123 = arith.mulf %118, %122 : vector<10x32xf32>
    %124 = vector.broadcast %103 : vector<1x32xf32> to vector<10x32xf32>
    %125 = arith.mulf %123, %124 : vector<10x32xf32>
    %126 = vector.broadcast %105 : vector<1x32xf32> to vector<10x32xf32>
    %127 = arith.addf %125, %126 : vector<10x32xf32>
    %128 = arith.truncf %127 : vector<10x32xf32> to vector<10x32xbf16>
    %c0_61 = arith.constant 0 : index
    %c0_62 = arith.constant 0 : index
    %c0_63 = arith.constant 0 : index
    %129 = vector.load %arg15[%c0_61, %c0_62, %c0_63] : memref<1x32x128xbf16, #tpu.memory_space<vmem>>, vector<1x32x128xbf16>
    %130 = vector.shape_cast %129 : vector<1x32x128xbf16> to vector<32x128xbf16>
    %cst_64 = arith.constant dense<0.000000e+00> : vector<10x128xf32>
    %131 = tpu.matmul %128, %130, %cst_64 {dimension_numbers = #tpu.dot_dimension_numbers<[1], [0], [0], [1], [0, 0, 1, 1], [], []>} : vector<10x32xbf16>, vector<32x128xbf16>, vector<10x128xf32> -> vector<10x128xf32>
    %c0_65 = arith.constant 0 : index
    %c0_66 = arith.constant 0 : index
    %c0_67 = arith.constant 0 : index
    %132 = vector.load %arg16[%c0_65, %c0_66, %c0_67] : memref<1x1x128xf32, #tpu.memory_space<vmem>>, vector<1x1x128xf32>
    %133 = vector.shape_cast %132 : vector<1x1x128xf32> to vector<1x128xf32>
    %134 = vector.broadcast %133 : vector<1x128xf32> to vector<10x128xf32>
    %135 = arith.addf %131, %134 : vector<10x128xf32>
    %136 = arith.mulf %135, %135 : vector<10x128xf32>
    %137 = arith.mulf %135, %136 : vector<10x128xf32>
    %cst_68 = arith.constant 4.471500e-02 : f32
    %138 = vector.broadcast %cst_68 : f32 to vector<10x128xf32>
    %139 = arith.mulf %138, %137 : vector<10x128xf32>
    %140 = arith.addf %135, %139 : vector<10x128xf32>
    %cst_69 = arith.constant 0.797884583 : f32
    %141 = vector.broadcast %cst_69 : f32 to vector<10x128xf32>
    %142 = arith.mulf %141, %140 : vector<10x128xf32>
    %143 = math.tanh %142 : vector<10x128xf32>
    %cst_70 = arith.constant 1.000000e+00 : f32
    %144 = vector.broadcast %cst_70 : f32 to vector<10x128xf32>
    %145 = arith.addf %144, %143 : vector<10x128xf32>
    %cst_71 = arith.constant 5.000000e-01 : f32
    %146 = vector.broadcast %cst_71 : f32 to vector<10x128xf32>
    %147 = arith.mulf %146, %145 : vector<10x128xf32>
    %148 = arith.mulf %135, %147 : vector<10x128xf32>
    %149 = arith.truncf %148 : vector<10x128xf32> to vector<10x128xbf16>
    %c0_72 = arith.constant 0 : index
    %c0_73 = arith.constant 0 : index
    %c0_74 = arith.constant 0 : index
    %150 = vector.load %arg17[%c0_72, %c0_73, %c0_74] : memref<1x128x32xbf16, #tpu.memory_space<vmem>>, vector<1x128x32xbf16>
    %151 = vector.shape_cast %150 : vector<1x128x32xbf16> to vector<128x32xbf16>
    %cst_75 = arith.constant dense<0.000000e+00> : vector<10x32xf32>
    %152 = tpu.matmul %149, %151, %cst_75 {dimension_numbers = #tpu.dot_dimension_numbers<[1], [0], [0], [1], [0, 0, 1, 1], [], []>} : vector<10x128xbf16>, vector<128x32xbf16>, vector<10x32xf32> -> vector<10x32xf32>
    %c0_76 = arith.constant 0 : index
    %c0_77 = arith.constant 0 : index
    %c0_78 = arith.constant 0 : index
    %153 = vector.load %arg18[%c0_76, %c0_77, %c0_78] : memref<1x1x32xf32, #tpu.memory_space<vmem>>, vector<1x1x32xf32>
    %154 = vector.shape_cast %153 : vector<1x1x32xf32> to vector<1x32xf32>
    %155 = vector.broadcast %154 : vector<1x32xf32> to vector<10x32xf32>
    %156 = arith.addf %152, %155 : vector<10x32xf32>
    %157 = arith.addf %101, %156 : vector<10x32xf32>
    %c0_79 = arith.constant 0 : index
    %c0_80 = arith.constant 0 : index
    %158 = vector.load %arg20[%c0_79, %c0_80] : memref<10x32xf32, #tpu.memory_space<vmem>>, vector<10x32xf32>
    tpu.vector_store %arg20[%c0_79, %c0_80], %157 {strides = array<i32>} : memref<10x32xf32, #tpu.memory_space<vmem>>, vector<10x32xf32>,
    %c1_i32 = arith.constant 1 : i32
    %159 = arith.cmpi eq, %arg1, %c1_i32 : i32
    %c3_i32 = arith.constant 3 : i32
    %160 = arith.cmpi eq, %arg1, %c3_i32 : i32
    %161 = arith.ori %159, %160 : i1
    %162 = arith.extui %161 : i1 to i32
    %c0_i32_81 = arith.constant 0 : i32
    %163 = arith.cmpi ne, %162, %c0_i32_81 : i32
    scf.if %163 {
      %164 = arith.truncf %157 : vector<10x32xf32> to vector<10x32xbf16>
      %c0_82 = arith.constant 0 : index
      %c0_83 = arith.constant 0 : index
      %c0_84 = arith.constant 0 : index
      %c0_85 = arith.constant 0 : index
      %165 = vector.load %arg19[%c0_82, %c0_83, %c0_84, %c0_85] : memref<1x1x10x32xbf16, #tpu.memory_space<vmem>>, vector<1x1x10x32xbf16>
      %166 = vector.shape_cast %165 : vector<1x1x10x32xbf16> to vector<10x32xbf16>
      %167 = vector.shape_cast %164 : vector<10x32xbf16> to vector<1x1x10x32xbf16>
      tpu.vector_store %arg19[%c0_82, %c0_83, %c0_84, %c0_85], %167 {strides = array<i32>} : memref<1x1x10x32xbf16, #tpu.memory_space<vmem>>, vector<1x1x10x32xbf16>,
    } else {
    }
    return
  }
  func.func @transform_0(%arg0: i32, %arg1: i32) -> (i32, i32, i32) {
    %c0_i32 = arith.constant 0 : i32
    %c0_i32_0 = arith.constant 0 : i32
    %c0_i32_1 = arith.constant 0 : i32
    return %arg0, %c0_i32, %c0_i32_0 : i32, i32, i32
  }
  func.func @transform_1(%arg0: i32, %arg1: i32) -> (i32, i32, i32) {
    %c0_i32 = arith.constant 0 : i32
    %c0_i32_0 = arith.constant 0 : i32
    %c0_i32_1 = arith.constant 0 : i32
    return %arg1, %c0_i32, %c0_i32_0 : i32, i32, i32
  }
  func.func @transform_2(%arg0: i32, %arg1: i32) -> (i32, i32, i32) {
    %c0_i32 = arith.constant 0 : i32
    %c0_i32_0 = arith.constant 0 : i32
    %c0_i32_1 = arith.constant 0 : i32
    return %arg1, %c0_i32, %c0_i32_0 : i32, i32, i32
  }
  func.func @transform_3(%arg0: i32, %arg1: i32) -> (i32, i32, i32) {
    %c0_i32 = arith.constant 0 : i32
    %c0_i32_0 = arith.constant 0 : i32
    %c0_i32_1 = arith.constant 0 : i32
    return %arg1, %c0_i32, %c0_i32_0 : i32, i32, i32
  }
  func.func @transform_4(%arg0: i32, %arg1: i32) -> (i32, i32, i32) {
    %c0_i32 = arith.constant 0 : i32
    %c0_i32_0 = arith.constant 0 : i32
    %c0_i32_1 = arith.constant 0 : i32
    return %arg1, %c0_i32, %c0_i32_0 : i32, i32, i32
  }
  func.func @transform_5(%arg0: i32, %arg1: i32) -> (i32, i32, i32) {
    %c0_i32 = arith.constant 0 : i32
    %c0_i32_0 = arith.constant 0 : i32
    %c0_i32_1 = arith.constant 0 : i32
    return %arg1, %c0_i32, %c0_i32_0 : i32, i32, i32
  }
  func.func @transform_6(%arg0: i32, %arg1: i32) -> (i32, i32, i32) {
    %c0_i32 = arith.constant 0 : i32
    %c0_i32_0 = arith.constant 0 : i32
    %c0_i32_1 = arith.constant 0 : i32
    return %arg1, %c0_i32, %c0_i32_0 : i32, i32, i32
  }
  func.func @transform_7(%arg0: i32, %arg1: i32) -> (i32, i32, i32) {
    %c0_i32 = arith.constant 0 : i32
    %c0_i32_0 = arith.constant 0 : i32
    %c0_i32_1 = arith.constant 0 : i32
    return %arg1, %c0_i32, %c0_i32_0 : i32, i32, i32
  }
  func.func @transform_8(%arg0: i32, %arg1: i32) -> (i32, i32, i32) {
    %c0_i32 = arith.constant 0 : i32
    %c0_i32_0 = arith.constant 0 : i32
    %c0_i32_1 = arith.constant 0 : i32
    return %arg1, %c0_i32, %c0_i32_0 : i32, i32, i32
  }
  func.func @transform_9(%arg0: i32, %arg1: i32) -> (i32, i32, i32) {
    %c0_i32 = arith.constant 0 : i32
    %c0_i32_0 = arith.constant 0 : i32
    %c0_i32_1 = arith.constant 0 : i32
    return %arg1, %c0_i32, %c0_i32_0 : i32, i32, i32
  }
  func.func @transform_10(%arg0: i32, %arg1: i32) -> (i32, i32, i32) {
    %c0_i32 = arith.constant 0 : i32
    %c0_i32_0 = arith.constant 0 : i32
    %c0_i32_1 = arith.constant 0 : i32
    return %arg1, %c0_i32, %c0_i32_0 : i32, i32, i32
  }
  func.func @transform_11(%arg0: i32, %arg1: i32) -> (i32, i32, i32) {
    %c0_i32 = arith.constant 0 : i32
    %c0_i32_0 = arith.constant 0 : i32
    %c0_i32_1 = arith.constant 0 : i32
    return %arg1, %c0_i32, %c0_i32_0 : i32, i32, i32
  }
  func.func @transform_12(%arg0: i32, %arg1: i32) -> (i32, i32, i32) {
    %c0_i32 = arith.constant 0 : i32
    %c0_i32_0 = arith.constant 0 : i32
    %c0_i32_1 = arith.constant 0 : i32
    return %arg1, %c0_i32, %c0_i32_0 : i32, i32, i32
  }
  func.func @transform_13(%arg0: i32, %arg1: i32) -> (i32, i32, i32) {
    %c0_i32 = arith.constant 0 : i32
    %c0_i32_0 = arith.constant 0 : i32
    %c0_i32_1 = arith.constant 0 : i32
    return %arg1, %c0_i32, %c0_i32_0 : i32, i32, i32
  }
  func.func @transform_14(%arg0: i32, %arg1: i32) -> (i32, i32, i32) {
    %c0_i32 = arith.constant 0 : i32
    %c0_i32_0 = arith.constant 0 : i32
    %c0_i32_1 = arith.constant 0 : i32
    return %arg1, %c0_i32, %c0_i32_0 : i32, i32, i32
  }
  func.func @transform_15(%arg0: i32, %arg1: i32) -> (i32, i32, i32) {
    %c0_i32 = arith.constant 0 : i32
    %c0_i32_0 = arith.constant 0 : i32
    %c0_i32_1 = arith.constant 0 : i32
    return %arg1, %c0_i32, %c0_i32_0 : i32, i32, i32
  }
  func.func @transform_16(%arg0: i32, %arg1: i32) -> (i32, i32, i32) {
    %c0_i32 = arith.constant 0 : i32
    %c0_i32_0 = arith.constant 0 : i32
    %c0_i32_1 = arith.constant 0 : i32
    return %arg1, %c0_i32, %c0_i32_0 : i32, i32, i32
  }
  func.func @transform_17(%arg0: i32, %arg1: i32) -> (i32, i32, i32, i32) {
    %c1_i32 = arith.constant 1 : i32
    %0 = arith.cmpi sgt, %arg1, %c1_i32 : i32
    %c1_i32_0 = arith.constant 1 : i32
    %c0_i32 = arith.constant 0 : i32
    %1 = arith.select %0, %c1_i32_0, %c0_i32 : i32
    %c0_i32_1 = arith.constant 0 : i32
    %2 = arith.addi %c0_i32_1, %1 : i32
    %c0_i32_2 = arith.constant 0 : i32
    %c0_i32_3 = arith.constant 0 : i32
    %c0_i32_4 = arith.constant 0 : i32
    return %2, %arg0, %c0_i32_2, %c0_i32_3 : i32, i32, i32, i32
  }
}

module attributes {stable_mosaic.version = 11 : i64} {
  func.func @_neck_decoder_kernel(%arg0: i32, %arg1: i32, %arg2: memref<1x1x3x32xbf16, #tpu.memory_space<vmem>>, %arg3: memref<1x1x3x32xbf16, #tpu.memory_space<vmem>>, %arg4: memref<16x32xbf16, #tpu.memory_space<vmem>>, %arg5: memref<16x32xbf16, #tpu.memory_space<vmem>>, %arg6: memref<16x1xf32, #tpu.memory_space<vmem>>, %arg7: memref<32x16xbf16, #tpu.memory_space<vmem>>, %arg8: memref<32x3xbf16, #tpu.memory_space<vmem>>, %arg9: memref<32x1xf32, #tpu.memory_space<vmem>>, %arg10: memref<32x1xf32, #tpu.memory_space<vmem>>, %arg11: memref<1x1xf32, #tpu.memory_space<vmem>>, %arg12: memref<3x588xbf16, #tpu.memory_space<vmem>>, %arg13: memref<1x1x3x588xbf16, #tpu.memory_space<vmem>>, %arg14: memref<1x1x1x588xf32, #tpu.memory_space<vmem>>) attributes {dimension_semantics = [#tpu.dimension_semantics<parallel>, #tpu.dimension_semantics<arbitrary>], iteration_bounds = array<i64: 2, 3>, scalar_prefetch = 0 : i64, scratch_operands = 0 : i64, tpu.core_type = #tpu.core_type<tc>, window_params = [{transform_indices = @transform_0, window_bounds = array<i64: 1, 1, 3, 32>}, {transform_indices = @transform_1, window_bounds = array<i64: 1, 1, 3, 32>}, {pipeline_mode = #tpu.pipeline_mode<synchronous>, transform_indices = @transform_2, window_bounds = array<i64: 16, 32>}, {pipeline_mode = #tpu.pipeline_mode<synchronous>, transform_indices = @transform_3, window_bounds = array<i64: 16, 32>}, {pipeline_mode = #tpu.pipeline_mode<synchronous>, transform_indices = @transform_4, window_bounds = array<i64: 16, 1>}, {pipeline_mode = #tpu.pipeline_mode<synchronous>, transform_indices = @transform_5, window_bounds = array<i64: 32, 16>}, {pipeline_mode = #tpu.pipeline_mode<synchronous>, transform_indices = @transform_6, window_bounds = array<i64: 32, 3>}, {pipeline_mode = #tpu.pipeline_mode<synchronous>, transform_indices = @transform_7, window_bounds = array<i64: 32, 1>}, {pipeline_mode = #tpu.pipeline_mode<synchronous>, transform_indices = @transform_8, window_bounds = array<i64: 32, 1>}, {pipeline_mode = #tpu.pipeline_mode<synchronous>, transform_indices = @transform_9, window_bounds = array<i64: 1, 1>}, {pipeline_mode = #tpu.pipeline_mode<synchronous>, transform_indices = @transform_10, window_bounds = array<i64: 3, 588>}, {transform_indices = @transform_11, window_bounds = array<i64: 1, 1, 3, 588>}, {transform_indices = @transform_12, window_bounds = array<i64: 1, 1, 1, 588>}]} {
    %c0 = arith.constant 0 : index
    %c0_0 = arith.constant 0 : index
    %0 = vector.load %arg4[%c0, %c0_0] : memref<16x32xbf16, #tpu.memory_space<vmem>>, vector<16x32xbf16>
    %c0_1 = arith.constant 0 : index
    %c0_2 = arith.constant 0 : index
    %c0_3 = arith.constant 0 : index
    %c0_4 = arith.constant 0 : index
    %1 = vector.load %arg2[%c0_1, %c0_2, %c0_3, %c0_4] : memref<1x1x3x32xbf16, #tpu.memory_space<vmem>>, vector<1x1x3x32xbf16>
    %2 = vector.shape_cast %1 : vector<1x1x3x32xbf16> to vector<3x32xbf16>
    %cst = arith.constant dense<0.000000e+00> : vector<16x3xf32>
    %3 = tpu.matmul %0, %2, %cst {dimension_numbers = #tpu.dot_dimension_numbers<[1], [1], [0], [0], [0, 0, 1, 0], [], []>} : vector<16x32xbf16>, vector<3x32xbf16>, vector<16x3xf32> -> vector<16x3xf32>
    %c0_5 = arith.constant 0 : index
    %c0_6 = arith.constant 0 : index
    %4 = vector.load %arg5[%c0_5, %c0_6] : memref<16x32xbf16, #tpu.memory_space<vmem>>, vector<16x32xbf16>
    %c0_7 = arith.constant 0 : index
    %c0_8 = arith.constant 0 : index
    %c0_9 = arith.constant 0 : index
    %c0_10 = arith.constant 0 : index
    %5 = vector.load %arg3[%c0_7, %c0_8, %c0_9, %c0_10] : memref<1x1x3x32xbf16, #tpu.memory_space<vmem>>, vector<1x1x3x32xbf16>
    %6 = vector.shape_cast %5 : vector<1x1x3x32xbf16> to vector<3x32xbf16>
    %cst_11 = arith.constant dense<0.000000e+00> : vector<16x3xf32>
    %7 = tpu.matmul %4, %6, %cst_11 {dimension_numbers = #tpu.dot_dimension_numbers<[1], [1], [0], [0], [0, 0, 1, 0], [], []>} : vector<16x32xbf16>, vector<3x32xbf16>, vector<16x3xf32> -> vector<16x3xf32>
    %8 = arith.addf %3, %7 : vector<16x3xf32>
    %c0_12 = arith.constant 0 : index
    %c0_13 = arith.constant 0 : index
    %9 = vector.load %arg6[%c0_12, %c0_13] : memref<16x1xf32, #tpu.memory_space<vmem>>, vector<16x1xf32>
    %10 = vector.broadcast %9 : vector<16x1xf32> to vector<16x3xf32>
    %11 = arith.addf %8, %10 : vector<16x3xf32>
    %12 = arith.mulf %11, %11 : vector<16x3xf32>
    %13 = arith.mulf %11, %12 : vector<16x3xf32>
    %cst_14 = arith.constant 4.471500e-02 : f32
    %14 = vector.broadcast %cst_14 : f32 to vector<16x3xf32>
    %15 = arith.mulf %14, %13 : vector<16x3xf32>
    %16 = arith.addf %11, %15 : vector<16x3xf32>
    %cst_15 = arith.constant 0.797884583 : f32
    %17 = vector.broadcast %cst_15 : f32 to vector<16x3xf32>
    %18 = arith.mulf %17, %16 : vector<16x3xf32>
    %19 = math.tanh %18 : vector<16x3xf32>
    %cst_16 = arith.constant 1.000000e+00 : f32
    %20 = vector.broadcast %cst_16 : f32 to vector<16x3xf32>
    %21 = arith.addf %20, %19 : vector<16x3xf32>
    %cst_17 = arith.constant 5.000000e-01 : f32
    %22 = vector.broadcast %cst_17 : f32 to vector<16x3xf32>
    %23 = arith.mulf %22, %21 : vector<16x3xf32>
    %24 = arith.mulf %11, %23 : vector<16x3xf32>
    %c0_18 = arith.constant 0 : index
    %c0_19 = arith.constant 0 : index
    %25 = vector.load %arg7[%c0_18, %c0_19] : memref<32x16xbf16, #tpu.memory_space<vmem>>, vector<32x16xbf16>
    %26 = arith.truncf %24 : vector<16x3xf32> to vector<16x3xbf16>
    %cst_20 = arith.constant dense<0.000000e+00> : vector<32x3xf32>
    %27 = tpu.matmul %25, %26, %cst_20 {dimension_numbers = #tpu.dot_dimension_numbers<[1], [0], [0], [1], [0, 0, 1, 1], [], []>} : vector<32x16xbf16>, vector<16x3xbf16>, vector<32x3xf32> -> vector<32x3xf32>
    %28 = arith.truncf %27 : vector<32x3xf32> to vector<32x3xbf16>
    %c0_21 = arith.constant 0 : index
    %c0_22 = arith.constant 0 : index
    %29 = vector.load %arg12[%c0_21, %c0_22] : memref<3x588xbf16, #tpu.memory_space<vmem>>, vector<3x588xbf16>
    %cst_23 = arith.constant dense<0.000000e+00> : vector<32x588xf32>
    %30 = tpu.matmul %28, %29, %cst_23 {dimension_numbers = #tpu.dot_dimension_numbers<[1], [0], [0], [1], [0, 0, 1, 1], [], []>} : vector<32x3xbf16>, vector<3x588xbf16>, vector<32x588xf32> -> vector<32x588xf32>
    %c0_24 = arith.constant 0 : index
    %c0_25 = arith.constant 0 : index
    %31 = vector.load %arg8[%c0_24, %c0_25] : memref<32x3xbf16, #tpu.memory_space<vmem>>, vector<32x3xbf16>
    %c0_26 = arith.constant 0 : index
    %c0_27 = arith.constant 0 : index
    %c0_28 = arith.constant 0 : index
    %c0_29 = arith.constant 0 : index
    %32 = vector.load %arg13[%c0_26, %c0_27, %c0_28, %c0_29] : memref<1x1x3x588xbf16, #tpu.memory_space<vmem>>, vector<1x1x3x588xbf16>
    %33 = vector.shape_cast %32 : vector<1x1x3x588xbf16> to vector<3x588xbf16>
    %cst_30 = arith.constant dense<0.000000e+00> : vector<32x588xf32>
    %34 = tpu.matmul %31, %33, %cst_30 {dimension_numbers = #tpu.dot_dimension_numbers<[1], [0], [0], [1], [0, 0, 1, 1], [], []>} : vector<32x3xbf16>, vector<3x588xbf16>, vector<32x588xf32> -> vector<32x588xf32>
    %35 = arith.addf %30, %34 : vector<32x588xf32>
    %c0_31 = arith.constant 0 : index
    %c0_32 = arith.constant 0 : index
    %36 = vector.load %arg9[%c0_31, %c0_32] : memref<32x1xf32, #tpu.memory_space<vmem>>, vector<32x1xf32>
    %37 = vector.broadcast %36 : vector<32x1xf32> to vector<32x588xf32>
    %38 = arith.addf %35, %37 : vector<32x588xf32>
    %cst_33 = arith.constant 0.000000e+00 : f32
    %39 = vector.broadcast %cst_33 : f32 to vector<32x588xf32>
    %40 = arith.maximumf %38, %39 : vector<32x588xf32>
    %c0_34 = arith.constant 0 : index
    %c0_35 = arith.constant 0 : index
    %41 = vector.load %arg10[%c0_34, %c0_35] : memref<32x1xf32, #tpu.memory_space<vmem>>, vector<32x1xf32>
    %42 = vector.broadcast %41 : vector<32x1xf32> to vector<32x588xf32>
    %43 = arith.mulf %42, %40 : vector<32x588xf32>
    %cst_36 = arith.constant dense<0.000000e+00> : vector<588xf32>
    %44 = vector.multi_reduction <add>, %43, %cst_36 [0] : vector<32x588xf32> to vector<588xf32>
    %45 = vector.shape_cast %44 : vector<588xf32> to vector<1x588xf32>
    %c0_37 = arith.constant 0 : index
    %c0_38 = arith.constant 0 : index
    %46 = vector.load %arg11[%c0_37, %c0_38] : memref<1x1xf32, #tpu.memory_space<vmem>>, vector<1x1xf32>
    %47 = vector.broadcast %46 : vector<1x1xf32> to vector<1x588xf32>
    %48 = arith.addf %45, %47 : vector<1x588xf32>
    %49 = arith.negf %48 : vector<1x588xf32>
    %50 = math.exp %49 : vector<1x588xf32>
    %cst_39 = arith.constant 1.000000e+00 : f32
    %51 = vector.broadcast %cst_39 : f32 to vector<1x588xf32>
    %52 = arith.addf %51, %50 : vector<1x588xf32>
    %53 = arith.divf %51, %52 : vector<1x588xf32>
    %c0_40 = arith.constant 0 : index
    %c0_41 = arith.constant 0 : index
    %c0_42 = arith.constant 0 : index
    %c0_43 = arith.constant 0 : index
    %54 = vector.load %arg14[%c0_40, %c0_41, %c0_42, %c0_43] : memref<1x1x1x588xf32, #tpu.memory_space<vmem>>, vector<1x1x1x588xf32>
    %55 = vector.shape_cast %54 : vector<1x1x1x588xf32> to vector<1x588xf32>
    %56 = vector.shape_cast %53 : vector<1x588xf32> to vector<1x1x1x588xf32>
    tpu.vector_store %arg14[%c0_40, %c0_41, %c0_42, %c0_43], %56 {strides = array<i32>} : memref<1x1x1x588xf32, #tpu.memory_space<vmem>>, vector<1x1x1x588xf32>,
    return
  }
  func.func @transform_0(%arg0: i32, %arg1: i32) -> (i32, i32, i32, i32) {
    %c0_i32 = arith.constant 0 : i32
    %c0_i32_0 = arith.constant 0 : i32
    %c0_i32_1 = arith.constant 0 : i32
    return %arg0, %arg1, %c0_i32, %c0_i32_0 : i32, i32, i32, i32
  }
  func.func @transform_1(%arg0: i32, %arg1: i32) -> (i32, i32, i32, i32) {
    %c0_i32 = arith.constant 0 : i32
    %c0_i32_0 = arith.constant 0 : i32
    %c0_i32_1 = arith.constant 0 : i32
    return %arg0, %arg1, %c0_i32, %c0_i32_0 : i32, i32, i32, i32
  }
  func.func @transform_2(%arg0: i32, %arg1: i32) -> (i32, i32) {
    %c0_i32 = arith.constant 0 : i32
    %c0_i32_0 = arith.constant 0 : i32
    %c0_i32_1 = arith.constant 0 : i32
    return %c0_i32, %c0_i32_0 : i32, i32
  }
  func.func @transform_3(%arg0: i32, %arg1: i32) -> (i32, i32) {
    %c0_i32 = arith.constant 0 : i32
    %c0_i32_0 = arith.constant 0 : i32
    %c0_i32_1 = arith.constant 0 : i32
    return %c0_i32, %c0_i32_0 : i32, i32
  }
  func.func @transform_4(%arg0: i32, %arg1: i32) -> (i32, i32) {
    %c0_i32 = arith.constant 0 : i32
    %c0_i32_0 = arith.constant 0 : i32
    %c0_i32_1 = arith.constant 0 : i32
    return %c0_i32, %c0_i32_0 : i32, i32
  }
  func.func @transform_5(%arg0: i32, %arg1: i32) -> (i32, i32) {
    %c0_i32 = arith.constant 0 : i32
    %c0_i32_0 = arith.constant 0 : i32
    %c0_i32_1 = arith.constant 0 : i32
    return %c0_i32, %c0_i32_0 : i32, i32
  }
  func.func @transform_6(%arg0: i32, %arg1: i32) -> (i32, i32) {
    %c0_i32 = arith.constant 0 : i32
    %c0_i32_0 = arith.constant 0 : i32
    %c0_i32_1 = arith.constant 0 : i32
    return %c0_i32, %c0_i32_0 : i32, i32
  }
  func.func @transform_7(%arg0: i32, %arg1: i32) -> (i32, i32) {
    %c0_i32 = arith.constant 0 : i32
    %c0_i32_0 = arith.constant 0 : i32
    %c0_i32_1 = arith.constant 0 : i32
    return %c0_i32, %c0_i32_0 : i32, i32
  }
  func.func @transform_8(%arg0: i32, %arg1: i32) -> (i32, i32) {
    %c0_i32 = arith.constant 0 : i32
    %c0_i32_0 = arith.constant 0 : i32
    %c0_i32_1 = arith.constant 0 : i32
    return %c0_i32, %c0_i32_0 : i32, i32
  }
  func.func @transform_9(%arg0: i32, %arg1: i32) -> (i32, i32) {
    %c0_i32 = arith.constant 0 : i32
    %c0_i32_0 = arith.constant 0 : i32
    %c0_i32_1 = arith.constant 0 : i32
    return %c0_i32, %c0_i32_0 : i32, i32
  }
  func.func @transform_10(%arg0: i32, %arg1: i32) -> (i32, i32) {
    %c0_i32 = arith.constant 0 : i32
    %c0_i32_0 = arith.constant 0 : i32
    %c0_i32_1 = arith.constant 0 : i32
    return %c0_i32, %c0_i32_0 : i32, i32
  }
  func.func @transform_11(%arg0: i32, %arg1: i32) -> (i32, i32, i32, i32) {
    %c0_i32 = arith.constant 0 : i32
    %c0_i32_0 = arith.constant 0 : i32
    %c0_i32_1 = arith.constant 0 : i32
    return %arg0, %arg1, %c0_i32, %c0_i32_0 : i32, i32, i32, i32
  }
  func.func @transform_12(%arg0: i32, %arg1: i32) -> (i32, i32, i32, i32) {
    %c0_i32 = arith.constant 0 : i32
    %c0_i32_0 = arith.constant 0 : i32
    %c0_i32_1 = arith.constant 0 : i32
    return %arg0, %arg1, %c0_i32, %c0_i32_0 : i32, i32, i32, i32
  }
}

</mosaic_0001>

<bundles_post_ra>
// kernel: forward.3
= control target key start
LH: loop header
LB: loop body
LE: loop exit
PB: predicated region body
PF: predicated region fallthrough
CT: control target
= control target key end

     0   :  { %s935_s15 = smov 0   ;;  %s1087_s0 = inlined_call_operand.vmem [shape: bf16[2,9,588], index: 0, kind: input, shape index: {}]   ;;  %s1088_s1 = inlined_call_operand.vmem [shape: bf16[588,32], index: 1, kind: input, shape index: {}]   ;;  %s1089_s2 = inlined_call_operand.vmem [shape: f32[1,32], index: 2, kind: input, shape index: {}]   ;;  %s1090_s3 = inlined_call_operand.vmem [shape: f32[9,32], index: 3, kind: input, shape index: {}]   ;;  %s1091_s4 = inlined_call_operand.vmem [shape: f32[2,9,32], index: 4, kind: output, shape index: {}]  }
   0x1 LB: > { %s726_s16 = sadd.s32 4294967295, %s906_s15   ;;  %p730_p0 = scmp.ge.s32.totalorder %s906_s15, 1  ;;  %s906_s15 = sphi %s935_s15, %s14_s15  }
   0x2   : > { %p162_p1 = scmp.lt.s32.totalorder %s906_s15, 3 }
   0x4   : > { %p163_p2 = pnand %p730_p0, %p162_p1 }
   0x5   : > { %v856_v0 = vld [vmem:[%s1088_s1 + $0x40] sm:$0xff] (!%p163_p2)   ;;  %v860_v4 = vld [vmem:[%s1088_s1 + $0x48] sm:$0xff] (!%p163_p2)   ;;  %v864_v8 = vld [vmem:[%s1088_s1 + $0x50] sm:$0xff] (!%p163_p2)   ;;  %p188_p3 = scmp.lt.s32.totalorder (!%p163_p2), %s726_s16, 1  ;;  %v908_v34 = vmov (!%p163_p2), 0.0   ;;  %vm909_vm0 = vmmov (!%p163_p2), 0  }
   0x6   : > { %166 = sbr.rel (%p163_p2) target bundleno = 277 (0x115), region = 36  ;;  %v857_v1 = vld [vmem:[%s1088_s1] sm:$0xff] (!%p163_p2)   ;;  %781 = vmatprep.subr.bf16.mxu0 (!%p163_p2), %v856_v0  ;;  %v861_v5 = vld [vmem:[%s1088_s1 + $0x8] sm:$0xff] (!%p163_p2)   ;;  %v865_v9 = vld [vmem:[%s1088_s1 + $0x10] sm:$0xff] (!%p163_p2)   ;;  %vm536_vm1 = vcmask (!%p163_p2), 1045504   ;;  %vm532_vm2 = vcmask (!%p163_p2), 621568  }
   0x7   : > { %v858_v2 = vld [vmem:[%s1088_s1 + $0xc0] sm:$0xff] (!%p163_p2)   ;;  %782 = vmatpush3.bf16.msra.mxu0 (!%p163_p2), %v857_v1  ;;  %v862_v6 = vld [vmem:[%s1088_s1 + $0xc8] sm:$0xff] (!%p163_p2)   ;;  %v866_v10 = vld [vmem:[%s1088_s1 + $0xd0] sm:$0xff] (!%p163_p2)   ;;  %vm667_vm3 = vcmask (!%p163_p2), 261120   ;;  %vm669_vm4 = vcmask (!%p163_p2), 253952  }
   0x8   : > { %v859_v3 = vld [vmem:[%s1088_s1 + $0x80] sm:$0xff] (!%p163_p2)   ;;  %803 = vmatprep.subr.bf16.mxu1 (!%p163_p2), %v858_v2  ;;  %783 = vmatprep.subr.bf16.mxu0 (!%p163_p2), %v860_v4  ;;  %v863_v7 = vld [vmem:[%s1088_s1 + $0x88] sm:$0xff] (!%p163_p2)   ;;  %v867_v11 = vld [vmem:[%s1088_s1 + $0x90] sm:$0xff] (!%p163_p2)  }
   0x9   : > { %804 = vmatpush3.bf16.msra.mxu1 (!%p163_p2), %v859_v3  ;;  %v868_v12 = vld [vmem:[%s1088_s1 + $0x58] sm:$0xff] (!%p163_p2)   ;;  %v872_v16 = vld [vmem:[%s1088_s1 + $0x60] sm:$0xff] (!%p163_p2)   ;;  %v876_v20 = vld [vmem:[%s1088_s1 + $0x68] sm:$0xff] (!%p163_p2)  }
   0xa   : > { %805 = vmatprep.subr.bf16.mxu1 (!%p163_p2), %v862_v6  ;;  %v869_v13 = vld [vmem:[%s1088_s1 + $0x18] sm:$0xff] (!%p163_p2)   ;;  %v873_v17 = vld [vmem:[%s1088_s1 + $0x20] sm:$0xff] (!%p163_p2)   ;;  %v877_v21 = vld [vmem:[%s1088_s1 + $0x28] sm:$0xff] (!%p163_p2)  }
   0xb   : > { %784 = vmatpush3.bf16.msra.mxu0 (!%p163_p2), %v861_v5  ;;  %v870_v14 = vld [vmem:[%s1088_s1 + $0xd8] sm:$0xff] (!%p163_p2)   ;;  %v874_v18 = vld [vmem:[%s1088_s1 + $0xe0] sm:$0xff] (!%p163_p2)   ;;  %v878_v22 = vld [vmem:[%s1088_s1 + $0xe8] sm:$0xff] (!%p163_p2)  }
   0xc   : > { %785 = vmatprep.subr.bf16.mxu0 (!%p163_p2), %v864_v8  ;;  %v871_v15 = vld [vmem:[%s1088_s1 + $0x98] sm:$0xff] (!%p163_p2)   ;;  %v875_v19 = vld [vmem:[%s1088_s1 + $0xa0] sm:$0xff] (!%p163_p2)   ;;  %v879_v23 = vld [vmem:[%s1088_s1 + $0xa8] sm:$0xff] (!%p163_p2)  }
   0xd   : > { %806 = vmatpush3.bf16.msra.mxu1 %v863_v7  ;;  %s1093_s16 = smov (!%p188_p3, %s726_s16), 1  ;;  %v880_v24 = vld [vmem:[%s1088_s1 + $0x70] sm:$0xff]   ;;  %v884_v28 = vld [vmem:[%s1088_s1 + $0x78] sm:$0xff]   ;;  %v894_v37 = vld [vmem:[%s1088_s1 + $0x100] sm:$0xff]  }
   0xe   : > { %807 = vmatprep.subr.bf16.mxu1 %v866_v10  ;;  %s845_s19 = smul.u32 40, %s1093_s16  ;;  %v881_v25 = vld [vmem:[%s1088_s1 + $0x30] sm:$0xff]   ;;  %v885_v29 = vld [vmem:[%s1088_s1 + $0x38] sm:$0xff]   ;;  %v895_v38 = vld [vmem:[%s1088_s1 + $0x108] sm:$0xff]   ;;  %s780_s25 = sshll.u32 %s1093_s16, 4 }
   0xf   : > { %786 = vmatpush3.bf16.msra.mxu0 %v865_v9  ;;  %v882_v26 = vld [vmem:[%s1088_s1 + $0xf0] sm:$0xff]   ;;  %v886_v30 = vld [vmem:[%s1088_s1 + $0xf8] sm:$0xff]   ;;  %v898_v41 = vld [vmem:[%s1088_s1 + $0x120] sm:$0x3f]  }
  0x10   : > { %787 = vmatprep.subr.bf16.mxu0 %v868_v12  ;;  %v883_v27 = vld [vmem:[%s1088_s1 + $0xb0] sm:$0xff]   ;;  %s1040_s30 = scalar_lea.vmem %s1087_s0, %s845_s19  ;;  %v890_v33 = vld [vmem:[%s1088_s1 + $0xb8] sm:$0xff]   ;;  %v538_v42 = vsel %vm536_vm1, %v898_v41, 0  ;;  %v734_v45 = vld [vmem:[%s1089_s2] ss:$0 sm:$0xff] }
  0x11   : > { %808 = vmatpush3.bf16.msra.mxu1 %v867_v11  ;;  %v887_v31 = vld [vmem:[%s1040_s30] ss:$20 sps:$4 sm:$0x1f]   ;;  %v889_v32 = vld [vmem:[%s1040_s30 + $0x4] ss:$20 sps:$4 sm:$0x1f]  }
  0x12   : > { %809 = vmatprep.subr.bf16.mxu1 %v870_v14  ;;  %572 = vmatprep.mubr.bf16.mxu0 %v889_v32  ;;  %v891_v35 = vld [vmem:[%s1040_s30 + $0x8] ss:$20 sps:$4 sm:$0x1f]   ;;  %v893_v36 = vld [vmem:[%s1040_s30 + $0xc] ss:$20 sps:$4 sm:$0x1f]  }
  0x13   : > { %788 = vmatpush3.bf16.msra.mxu0 %v869_v13  ;;  %613 = vmatprep.mubr.bf16.mxu1 %v893_v36  ;;  %v896_v39 = vld [vmem:[%s1088_s1 + $0x110] sm:$0xff]   ;;  %v897_v40 = vld [vmem:[%s1088_s1 + $0x118] sm:$0xff]   ;;  %v663_v62 = vld [vmem:[%s1090_s3] sm:$0xff] }
  0x14   : > { %789 = vmatprep.subr.bf16.mxu0 %v872_v16  ;;  %v899_v43 = vld [vmem:[%s1040_s30 + $0x10] ss:$20 sps:$4 sm:$0x1f]   ;;  %s197_s30 = scalar_lea.vmem %s1091_s4, %s780_s25  ;;  %v664_v2 = vld [vmem:[%s1090_s3 + $0x8] sm:$0x1] }
  0x15   : > { %810 = vmatpush3.bf16.msra.mxu1 %v871_v15 }
  0x16   : > { %811 = vmatprep.subr.bf16.mxu1 %v874_v18 }
  0x17   : > { %790 = vmatpush3.bf16.msra.mxu0 %v873_v17 }
  0x18   : > { %791 = vmatprep.subr.bf16.mxu0 %v876_v20 }
  0x19   : > { %812 = vmatpush3.bf16.msra.mxu1 %v875_v19 }
  0x1a   : > { %813 = vmatprep.subr.bf16.mxu1 %v878_v22 }
  0x1b   : > { %792 = vmatpush3.bf16.msra.mxu0 %v877_v21 }
  0x1c   : > { %793 = vmatprep.subr.bf16.mxu0 %v880_v24 }
  0x1d   : > { %814 = vmatpush3.bf16.msra.mxu1 %v879_v23 }
  0x1e   : > { %815 = vmatprep.subr.bf16.mxu1 %v882_v26 }
  0x1f   : > { %794 = vmatpush3.bf16.msra.mxu0 %v881_v25 }
  0x20   : > { %795 = vmatprep.subr.bf16.mxu0 %v884_v28 }
  0x21   : > { %816 = vmatpush3.bf16.msra.mxu1 %v883_v27 }
  0x22   : > { %817 = vmatprep.subr.bf16.mxu1 %v886_v30 }
  0x23   : > { %796 = vmatpush3.bf16.msra.mxu0 %v885_v29 }
  0x24   : > { %831 = vmatprep.subr.bf16.mxu0 %v908_v34 }
  0x25   : > { %818 = vmatpush3.bf16.msra.mxu1 %v890_v33 }
  0x26   : > { %573 = vmatmul.mubr.bf16.vlgmr.msra.gmra.mrb[0].mxu0 %v887_v31 }
  0x27   : > { %841 = vmatprep.mubr.msk.bf16.mxu0 %vm909_vm0, %v908_v34  ;;  %832 = vmatpush3.bf16.msra.mxu0 %v894_v37 }
  0x28   : > { %614 = vmatmul.mubr.bf16.vlgmr.msra.gmra.mrb[0].mxu1 %v891_v35  ;;  %833 = vmatprep.subr.bf16.mxu0 %v908_v34 }
  0x2b   : > { %834 = vmatpush3.bf16.msra.mxu0 %v895_v38 }
  0x2c   : > { %835 = vmatprep.subr.bf16.mxu0 %v908_v34 }
  0x2f   : > { %836 = vmatpush3.bf16.msra.mxu0 %v896_v39 }
  0x30   : > { %837 = vmatprep.subr.bf16.mxu0 %v908_v34 }
  0x33   : > { %838 = vmatpush3.bf16.msra.mxu0 %v897_v40 }
  0x34   : > { %839 = vmatprep.subr.bf16.mxu0 %v908_v34 }
  0x37   : > { %840 = vmatpush3.bf16.msra.mxu0 %v538_v42 }
  0x3a   : > { %842 = vmatmul.mubr.msk.bf16.vlgmr.msra.gmra.mrb[4].mxu0 %vm532_vm2, %v899_v43 }
  0xf9   : > { %v797_v44 = vpop.f32.mrb[0].mxu0 }
  0xfa   : > { %v798_v46 = vpop.f32.mrb[1].mxu0 }
  0xfb   : > { %v799_v47 = vadd.f32 %v798_v46, %v797_v44  ;;  %v800_v48 = vpop.f32.mrb[2].mxu0  ;;  %v819_v49 = vpop.f32.mrb[0].mxu1 }
  0xfc   : > { %v801_v50 = vpop.f32.mrb[3].mxu0  ;;  %v820_v51 = vpop.f32.mrb[1].mxu1 }
  0xfd   : > { %v575_v52 = vadd.f32 %v799_v47, %v734_v45  ;;  %v802_v53 = vadd.f32 %v801_v50, %v800_v48  ;;  %v821_v54 = vadd.f32 %v820_v51, %v819_v49  ;;  %v822_v55 = vpop.f32.mrb[2].mxu1 }
  0xfe   : > { %v823_v56 = vpop.f32.mrb[3].mxu1 }
  0xff   : > { %v578_v57 = vadd.f32 %v802_v53, %v734_v45  ;;  %v824_v58 = vadd.f32 %v823_v56, %v822_v55  ;;  %v616_v59 = vadd.f32 %v821_v54, %v575_v52 }
 0x101   : > { %v619_v60 = vadd.f32 %v824_v58, %v578_v57 }
 0x10d   : > { %v656_v61 = vpop.f32.mrb[4].mxu0 }
 0x10e   : > { %v657_v63 = vadd.f32 %v656_v61, %v616_v59  ;;  %v843_v0 = vpop.f32.mrb[5].mxu0 }
 0x10f   : > { %v659_v1 = vpop.f32.mrb[6].mxu0 }
 0x110   : > { %v665_v3 = vadd.f32 %v663_v62, %v657_v63  ;;  %v660_v4 = vadd.f32 %v659_v1, %v619_v60  ;;  %v844_v5 = vpop.f32.mrb[7].mxu0 }
 0x112   : > { %668 = vst.msk [vmem:[%s197_s30] sm:$0xff] %vm667_vm3, %v665_v3  ;;  %v666_v6 = vadd.f32 %v664_v2, %v660_v4 }
 0x114   : > { %670 = vst.msk [vmem:[%s197_s30 + $0x8] sm:$0x1] %vm669_vm4, %v666_v6 }
 0x115 PF: > { %s14_s15 = sadd.s32 1, %s906_s15  }
 0x116   : > { %p11_p4 = scmp.ge.s32.totalorder %s14_s15, 4  }
 0x118   :  { %13 = sbr.rel (!%p11_p4) target bundleno = 1 (0x1), region = 66 }

// kernel: forward.4
= control target key start
LH: loop header
LB: loop body
LE: loop exit
PB: predicated region body
PF: predicated region fallthrough
CT: control target
= control target key end

     0   :  { %s2360_s24 = smov 0   ;;  %s2362_s25 = smov 0   ;;  %s2672_s0 = inlined_call_operand.vmem [shape: f32[2,10,32], index: 0, kind: input, shape index: {}]   ;;  %s2673_s1 = inlined_call_operand.vmem [shape: f32[4,1,32], index: 1, kind: input, shape index: {}]   ;;  %s2674_s2 = inlined_call_operand.vmem [shape: f32[4,1,32], index: 2, kind: input, shape index: {}]   ;;  %s2675_s3 = inlined_call_operand.vmem [shape: bf16[4,32,32], index: 3, kind: input, shape index: {}]   ;;  %s2676_s4 = inlined_call_operand.vmem [shape: f32[4,1,32], index: 4, kind: input, shape index: {}]   ;;  %s2677_s5 = inlined_call_operand.vmem [shape: bf16[4,32,32], index: 5, kind: input, shape index: {}]   ;;  %s2678_s6 = inlined_call_operand.vmem [shape: f32[4,1,32], index: 6, kind: input, shape index: {}]   ;;  %s2679_s7 = inlined_call_operand.vmem [shape: bf16[4,32,32], index: 7, kind: input, shape index: {}]   ;;  %s2680_s8 = inlined_call_operand.vmem [shape: f32[4,1,32], index: 8, kind: input, shape index: {}]   ;;  %s2681_s9 = inlined_call_operand.vmem [shape: bf16[4,32,32], index: 9, kind: input, shape index: {}]   ;;  %s2682_s10 = inlined_call_operand.vmem [shape: f32[4,1,32], index: 10, kind: input, shape index: {}]   ;;  %s2683_s11 = inlined_call_operand.vmem [shape: f32[4,1,32], index: 11, kind: input, shape index: {}]   ;;  %s2684_s12 = inlined_call_operand.vmem [shape: f32[4,1,32], index: 12, kind: input, shape index: {}]   ;;  %s2685_s13 = inlined_call_operand.vmem [shape: bf16[4,32,128], index: 13, kind: input, shape index: {}]   ;;  %s2686_s14 = inlined_call_operand.vmem [shape: f32[4,1,128], index: 14, kind: input, shape index: {}]   ;;  %s2687_s15 = inlined_call_operand.vmem [shape: bf16[4,128,32], index: 15, kind: input, shape index: {}]   ;;  %s2688_s16 = inlined_call_operand.vmem [shape: f32[4,1,32], index: 16, kind: input, shape index: {}]   ;;  %s2689_s17 = inlined_call_operand.vmem [shape: bf16[2,2,10,32], index: 17, kind: output, shape index: {}]  }
   0x1   :  { %2694 = sst [smem:[#allocation9_spill]] %s2672_s0  ;;  %s2364_s26 = smov 0  }
   0x2   :  { %2695 = sst [smem:[#allocation10_spill]] %s2673_s1  ;;  %s2366_s27 = smov 0  }
   0x3   :  { %2696 = sst [smem:[#allocation11_spill]] %s2675_s3  ;;  %s2368_s28 = smov 0  }
   0x4   :  { %2697 = sst [smem:[#allocation12_spill]] %s2676_s4 }
   0x5   :  { %2698 = sst [smem:[#allocation13_spill]] %s2677_s5 }
   0x6   :  { %2699 = sst [smem:[#allocation14_spill]] %s2678_s6 }
   0x7   :  { %2700 = sst [smem:[#allocation15_spill]] %s2679_s7 }
   0x8   :  { %2701 = sst [smem:[#allocation16_spill]] %s2681_s9 }
   0x9   :  { %2702 = sst [smem:[#allocation17_spill]] %s2682_s10 }
   0xa   :  { %2703 = sst [smem:[#allocation18_spill]] %s2683_s11 }
   0xb   :  { %2704 = sst [smem:[#allocation19_spill]] %s2686_s14 }
   0xc   :  { %2705 = sst [smem:[#allocation20_spill]] %s2687_s15 }
   0xd   :  { %2706 = sst [smem:[#allocation21_spill]] %s2688_s16 }
   0xe   :  { %2707 = sst [smem:[#allocation22_spill]] %s2689_s17 }
   0xf LB: > { %2708 = sst [smem:[#allocation3_spill]] %s2256_s26  ;;  %s36_s29 = sadd.s32 1, %s2256_s26  ;;  %s2264_s28 = sphi %s2368_s28, %s27_s28   ;;  %s2260_s27 = sphi %s2366_s27, %s2748_s27   ;;  %s2256_s26 = sphi %s2364_s26, %s2747_s26   ;;  %s2252_s25 = sphi %s2362_s25, %s2746_s25   ;;  %s2248_s24 = sphi %s2360_s24, %s2745_s24  }
  0x10   : > { %2709 = sst [smem:[#allocation4_spill]] %s2260_s27  ;;  %s39_s0 = sadd.s32 1, %s2260_s27 }
  0x11   : > { %2710 = sst [smem:[#allocation5_spill]] %s2264_s28  ;;  %p37_p0 = scmp.ge.s32.totalorder %s36_s29, 4 }
  0x12   : > { %p1951_p1 = scmp.ge.s32.totalorder %s2264_s28, 1  ;;  %p645_p2 = scmp.lt.s32.totalorder %s2264_s28, 9 }
  0x13   : > { %s2750_s29 = smov (%p37_p0, %s36_s29), 0  ;;  %s2752_s0 = smov (!%p37_p0, %s39_s0), %s2260_s27 }
  0x14   : > { %2711 = sst [smem:[#allocation6_spill]] %s2750_s29  ;;  %p646_p3 = pnand %p1951_p1, %p645_p2 }
  0x15   : > { %p41_p4 = scmp.ge.s32.totalorder %s2752_s0, 2 }
  0x16   : > { %649 = sbr.rel (%p646_p3) target bundleno = 2586 (0xa1a), region = 88 }
  0x17   : > { %s2754_s0 = smov (%p41_p4, %s2752_s0), 0 }
  0x18   : > { %2712 = sst [smem:[#allocation7_spill]] %s2754_s0 }
  0x1d   : > { %p763_p5 = scmp.lt.s32.totalorder %s2252_s25, 1  ;;  %p768_p6 = scmp.lt.s32.totalorder %s2248_s24, 3 }
  0x1e   : > { %p828_p7 = scmp.gt.s32.totalorder %s2248_s24, 1  ;;  %s2713_s20 = sld [smem:[#allocation9_spill]] }
  0x1f   : > { %s2756_s25 = smov (!%p763_p5, %s2252_s25), 1  ;;  %s2715_s3 = sld [smem:[#allocation11_spill]] }
  0x20   : > { %s2396_s30 = scalar_select %p768_p6, %s2248_s24, 3 }
  0x21   : > { %s2011_s18 = sshll.u32 %s2756_s25, 4  ;;  %s2717_s5 = sld [smem:[#allocation13_spill]] }
  0x22   : > { %s2012_s17 = sshll.u32 %s2396_s30, 4  ;;  %s2719_s7 = sld [smem:[#allocation15_spill]] }
  0x23   : > { %s2720_s9 = sld [smem:[#allocation16_spill]]  ;;  %s2461_s16 = scalar_lea.vmem %s2685_s13, %s2012_s17 }
  0x24   : > { %s2403_s21 = scalar_lea.vmem %s2713_s20, %s2011_s18  ;;  %s2725_s4 = sld [smem:[#allocation21_spill]] }
  0x25   : > { %s2417_s14 = scalar_lea.vmem %s2715_s3, %s2012_s17  ;;  %s2726_s23 = sld [smem:[#allocation20_spill]] }
  0x26   : > { %s829_s28 = scalar_select %p828_p7, 1, 0 }
  0x27   : > { %s2426_s0 = scalar_lea.vmem %s2717_s5, %s2012_s17  ;;  %s1966_s6 = sshll.u32 %s2756_s25, 1 }
  0x28   : > { %s2435_s15 = scalar_lea.vmem %s2719_s7, %s2012_s17  ;;  %s811_s7 = scalar_lea.vmem %s2684_s12, %s2396_s30 }
  0x29   : > { %s2444_s20 = scalar_lea.vmem %s2720_s9, %s2012_s17  ;;  %p830_p8 = scmp.lt.s32.totalorder %s829_s28, 1 }
  0x2a   : > { %2721 = sst [smem:[#allocation8_spill]] %s2444_s20  ;;  %s2017_s20 = sshll.u32 %s2396_s30, 6 }
  0x2b   : > { %s827_s10 = scalar_lea.vmem %s2725_s4, %s2396_s30  ;;  %s2475_s11 = scalar_lea.vmem %s2726_s23, %s2017_s20 }
  0x2c   : > { %s2758_s28 = smov (!%p830_p8, %s829_s28), 1  ;;  %s2727_s18 = sld [smem:[#allocation22_spill]] }
  0x2d   : > { %s1967_s17 = sshll.u32 %s2758_s28, 2  ;;  %p1969_p9 = scmp.ne.s32.totalorder %s2248_s24, 0 }
  0x2e   : > { %s836_s29 = sadd.s32 %s1967_s17, %s1966_s6  ;;  %v846_v0 = vld [vmem:[%s2403_s21] sm:$0xff] (!%p1969_p9)  ;;  %vm848_vm0 = vcmask (!%p1969_p9), 261120   ;;  %v847_v1 = vld [vmem:[%s2403_s21 + $0x8] sm:$0x3] (!%p1969_p9)  ;;  %vm850_vm1 = vcmask (!%p1969_p9), 254976  }
  0x2f   : > { %s1968_s3 = sshll.u32 %s836_s29, 2  ;;  %845 = sbr.rel (%p1969_p9) target bundleno = 54 (0x36), region = 92  ;;  %849 = vst.msk [vmem:[#allocation2] sm:$0xff] (!%p1969_p9), %vm848_vm0, %v846_v0 }
  0x30   : > { %851 = vst.msk [vmem:[#allocation2 + $0x8] sm:$0x3] (!%p1969_p9), %vm850_vm1, %v847_v1 }
  0x32   : > { %s2483_s9 = scalar_lea.vmem %s2727_s18, %s1968_s3 }
  0x36 PF: > { %v2488_v2 = vld [vmem:[#allocation2] sm:$0xff]  ;;  %vm856_vm2 = vcmask 261120   ;;  %vm860_vm3 = vcmask 254976   ;;  %v2266_v17 = vmov 0.0   ;;  %v2181_v18 = vld [vmem:[%s2417_s14 + $0x8] sm:$0xff]   ;;  %vm2267_vm4 = vmmov 0   ;;  %s2730_s5 = scalar_lea.vmem %s2674_s2, %s2396_s30  ;;  %s2735_s19 = scalar_lea.vmem %s2680_s8, %s2396_s30 }
  0x37   : > { %v2490_v3 = vld [vmem:[#allocation2 + $0x8] sm:$0x3]  ;;  %v857_v4 = vsel %vm856_vm2, %v2488_v2, 0.0  ;;  %v2180_v16 = vld [vmem:[%s2417_s14] sm:$0xff]   ;;  %2052 = vmatprep.subr.bf16.mxu0 %v2266_v17  ;;  %2076 = vmatprep.subr.bf16.mxu1 %v2266_v17  ;;  %s2728_s25 = sld [smem:[#allocation10_spill]]  ;;  %s2731_s26 = sld [smem:[#allocation12_spill]] }
  0x38   : > { %v861_v5 = vsel %vm860_vm3, %v2490_v3, 0.0  ;;  %858 = vadd.xlane.f32.xlu0 %v857_v4  ;;  %2053 = vmatpush3.bf16.msra.mxu0 %v2180_v16  ;;  %v1971_v31 = vld [vmem:[%s2730_s5] ss:$0 sm:$0xff]  ;;  %v2183_v37 = vld [vmem:[%s2426_s0 + $0x8] sm:$0xff]   ;;  %s2733_s17 = sld [smem:[#allocation14_spill]]  ;;  %vm1100_vm5 = vcmask 130048  }
  0x39   : > { %2056 = vmatprep.mubr.msk.bf16.mxu0 %vm2267_vm4, %v2266_v17  ;;  %2054 = vmatprep.subr.bf16.mxu0 %v2266_v17  ;;  %v2182_v35 = vld [vmem:[%s2426_s0] sm:$0xff]   ;;  %v2185_v39 = vld [vmem:[%s2435_s15 + $0x8] sm:$0xff]   ;;  %vm1178_vm6 = vcmask 1044480   ;;  %vm1150_vm7 = vcmask 80896   ;;  %vm1154_vm8 = vcmask 74752   ;;  %s2736_s18 = sld [smem:[#allocation8_spill]] }
  0x3a   : > { %2078 = vmatprep.mubr.msk.bf16.mxu1 %vm2267_vm4, %v2266_v17  ;;  %v2184_v38 = vld [vmem:[%s2435_s15] sm:$0xff]   ;;  %s2268_s15 = smov 112   ;;  %s2269_s4 = smov 16  }
  0x3b   : > { %v1980_v57 = vld [vmem:[%s2735_s19] ss:$0 sm:$0xff]  ;;  %s2739_s0 = sld [smem:[#allocation18_spill]]  ;;  %p1674_p10 = scmp.eq.s32.totalorder %s2248_s24, 1 }
  0x3c   : > { %862 = vadd.xlane.f32.xlu0 %v861_v5  ;;  %2055 = vmatpush3.bf16.msra.mxu0 %v2181_v18  ;;  %p1675_p11 = scmp.eq.s32.totalorder %s2248_s24, 3 }
  0x3d   : > { %2060 = vmatprep.subr.bf16.mxu0 %v2266_v17  ;;  %s2729_s21 = scalar_lea.vmem %s2728_s25, %s2396_s30  ;;  %s2732_s27 = scalar_lea.vmem %s2731_s26, %s2396_s30 }
  0x3e   : > { %v1970_v27 = vld [vmem:[%s2729_s21] ss:$0 sm:$0xff]  ;;  %s2734_s29 = scalar_lea.vmem %s2733_s17, %s2396_s30  ;;  %s2737_s21 = sld [smem:[#allocation17_spill]] }
  0x3f   : > { %v1972_v40 = vld [vmem:[%s2732_s27] ss:$0 sm:$0xff]  ;;  %p1676_p12 = por %p1675_p11, %p1674_p10 }
  0x40   : > { %v1976_v48 = vld [vmem:[%s2734_s29] ss:$0 sm:$0xff]  ;;  %vm1688_vm9 = vcmask (%p1676_p12), 257024   ;;  %vm1690_vm10 = vcmask (%p1676_p12), 253952  }
  0x41   : > { %s2740_s22 = scalar_lea.vmem %s2739_s0, %s2396_s30 }
  0x44   : > { %s2738_s23 = scalar_lea.vmem %s2737_s21, %s2396_s30 }
  0xc5   : > { %v859_v6 = vpop.xlane.xlu0 %858 }
  0xc6   : > { %v865_v7 = vmul.f32 0.03125, %v859_v6 }
  0xc8   : > { %v867_v8 = vsub.f32 %v2488_v2, %v865_v7 }
  0xc9   : > { %v863_v9 = vpop.xlane.xlu0 %862 }
  0xca   : > { %v866_v10 = vmul.f32 0.03125, %v863_v9  ;;  %v869_v11 = vmul.f32 %v867_v8, %v867_v8 }
  0xcc   : > { %v868_v12 = vsub.f32 %v2490_v3, %v866_v10  ;;  %v871_v13 = vsel %vm856_vm2, %v869_v11, 0.0 }
  0xcd   : > { %872 = vadd.xlane.f32.xlu1 %v871_v13 }
  0xce   : > { %v870_v14 = vmul.f32 %v868_v12, %v868_v12 }
  0xd0   : > { %v874_v15 = vsel %vm860_vm3, %v870_v14, 0.0 }
  0xd1   : > { %875 = vadd.xlane.f32.xlu1 %v874_v15 }
 0x15a   : > { %v873_v19 = vpop.xlane.xlu1 %872 }
 0x15b   : > { %v877_v20 = vmul.f32 0.03125, %v873_v19 }
 0x15d   : > { %v879_v21 = vadd.f32 1e-06, %v877_v20 }
 0x15e   : > { %v876_v22 = vpop.xlane.xlu1 %875 }
 0x15f   : > { %2198 = vrsqrt.f32 %v879_v21  ;;  %v878_v23 = vmul.f32 0.03125, %v876_v22 }
 0x161   : > { %v880_v24 = vadd.f32 1e-06, %v878_v23 }
 0x163   : > { %2200 = vrsqrt.f32 %v880_v24 }
 0x169   : > { %v2199_v25 = vpop.eup %2198 }
 0x16a   : > { %v883_v26 = vmul.f32 %v2199_v25, %v867_v8 }
 0x16c   : > { %v891_v30 = vmul.f32 %v1970_v27, %v883_v26 }
 0x16d   : > { %v2201_v28 = vpop.eup %2200 }
 0x16e   : > { %v884_v29 = vmul.f32 %v2201_v28, %v868_v12  ;;  %v899_v33 = vadd.f32 %v1971_v31, %v891_v30 }
 0x170   : > { %v892_v32 = vmul.f32 %v1970_v27, %v884_v29 }
 0x172   : > { %v900_v34 = vadd.f32 %v1971_v31, %v892_v32 }
 0x174   : > { %v901_v36 = vpack.c.bf16 %v900_v34, %v899_v33 }
 0x176   : > { %2057 = vmatmul.mubr.msk.bf16.vlgmr.msra.gmra.mrb[0].mxu0 %vm856_vm2, %v901_v36 }
 0x177   : > { %2061 = vmatpush3.bf16.msra.mxu0 %v2182_v35  ;;  %2064 = vmatprep.mubr.msk.bf16.mxu0 %vm2267_vm4, %v2266_v17 }
 0x178   : > { %2062 = vmatprep.subr.bf16.mxu0 %v2266_v17 }
 0x17b   : > { %2063 = vmatpush3.bf16.msra.mxu0 %v2183_v37 }
 0x17c   : > { %2068 = vmatprep.subr.bf16.mxu0 %v2266_v17 }
 0x17e   : > { %2065 = vmatmul.mubr.msk.bf16.vlgmr.msra.gmra.mrb[4].mxu0 %vm856_vm2, %v901_v36 }
 0x17f   : > { %2069 = vmatpush3.bf16.msra.mxu0 %v2184_v38  ;;  %2072 = vmatprep.mubr.msk.bf16.mxu0 %vm2267_vm4, %v2266_v17 }
 0x180   : > { %2070 = vmatprep.subr.bf16.mxu0 %v2266_v17 }
 0x183   : > { %2071 = vmatpush3.bf16.msra.mxu0 %v2185_v39 }
 0x184   : > { %2082 = vmatprep.subr.bf16.mxu0 %v2266_v17 }
 0x186   : > { %2073 = vmatmul.mubr.msk.bf16.vlgmr.msra.gmra.mrb[8].mxu0 %vm856_vm2, %v901_v36 }
 0x187   : > { %2084 = vmatprep.mubr.msk.bf16.mxu0 %vm2267_vm4, %v2266_v17 }
 0x249   : > { %v962_v41 = vpop.f32.mrb[0].mxu0 }
 0x24a   : > { %v2058_v42 = vpop.f32.mrb[1].mxu0  ;;  %v963_v44 = vadd.f32 %v1972_v40, %v962_v41 }
 0x24b   : > { %v965_v43 = vpop.f32.mrb[2].mxu0 }
 0x24c   : > { %v966_v45 = vadd.f32 %v1972_v40, %v965_v43  ;;  %v2059_v46 = vpop.f32.mrb[3].mxu0 }
 0x24e   : > { %v1097_v47 = vpack.c.bf16 %v966_v45, %v963_v44 }
 0x250   : > { %1225 = vrot.lane.b32.xlu1 %v1097_v47, %s2268_s15 }
 0x251   : > { %v1026_v49 = vpop.f32.mrb[4].mxu0 }
 0x252   : > { %v2066_v50 = vpop.f32.mrb[5].mxu0  ;;  %v1027_v52 = vadd.f32 %v1976_v48, %v1026_v49 }
 0x253   : > { %v1029_v51 = vpop.f32.mrb[6].mxu0 }
 0x254   : > { %v1030_v53 = vadd.f32 %v1976_v48, %v1029_v51  ;;  %v2067_v54 = vpop.f32.mrb[7].mxu0 }
 0x256   : > { %v1098_v55 = vpack.c.bf16 %v1030_v53, %v1027_v52 }
 0x258   : > { %1228 = vrot.lane.b32.xlu0 %v1098_v55, %s2268_s15  ;;  %v1105_v56 = vsel %vm1100_vm5, %v1098_v55, 0 }
 0x259   : > { %v1090_v58 = vpop.f32.mrb[8].mxu0  ;;  %2077 = vmatpush3.bf16.xpose.msra.mxu1 %v1105_v56 }
 0x25a   : > { %v2074_v59 = vpop.f32.mrb[9].mxu0  ;;  %2088 = vmatprep.subr.bf16.mxu1 %v2266_v17  ;;  %v1091_v61 = vadd.f32 %v1980_v57, %v1090_v58 }
 0x25b   : > { %v1093_v60 = vpop.f32.mrb[10].mxu0 }
 0x25c   : > { %v1094_v62 = vadd.f32 %v1980_v57, %v1093_v60  ;;  %v2075_v63 = vpop.f32.mrb[11].mxu0  ;;  %v2186_v60 = vld [vmem:[%s2736_s18] sm:$0xff]  }
 0x25e   : > { %v1099_v0 = vpack.c.bf16 %v1094_v62, %v1091_v61  ;;  %v2187_v61 = vld [vmem:[%s2736_s18 + $0x8] sm:$0xff]  }
 0x260   : > { %2079 = vmatmul.mubr.msk.bf16.vlgmr.msra.gmra.mrb[0].mxu1 %vm1100_vm5, %v1097_v47  ;;  %v1180_v1 = vsel %vm1178_vm6, %v1099_v0, 0 }
 0x261   : > { %2083 = vmatpush3.bf16.msra.mxu0 %v1180_v1  ;;  %2090 = vmatprep.mubr.msk.bf16.mxu1 %vm2267_vm4, %v2266_v17 }
 0x262   : > { %2094 = vmatprep.subr.bf16.mxu0 %v2266_v17 }
 0x2c2   : > { %v1226_v6 = vpop.permute.xlu1 %1225 }
 0x2ca   : > { %v1229_v4 = vpop.permute.xlu0 %1228 }
 0x2cb   : > { %v1234_v5 = vsel %vm1100_vm5, %v1229_v4, 0 }
 0x2cc   : > { %2089 = vmatpush3.bf16.xpose.msra.mxu1 %v1234_v5 }
 0x2cd   : > { %2100 = vmatprep.subr.bf16.mxu1 %v2266_v17 }
 0x2d3   : > { %2091 = vmatmul.mubr.msk.bf16.vlgmr.msra.gmra.mrb[4].mxu1 %vm1100_vm5, %v1226_v6 }
 0x2d4   : > { %2104 = vmatprep.mubr.msk.bf16.mxu1 %vm2267_vm4, %v2266_v17  ;;  %2101 = vmatpush3.bf16.msra.mxu1 %v2186_v60 }
 0x2d5   : > { %2102 = vmatprep.subr.bf16.mxu1 %v2266_v17 }
 0x2d8   : > { %2103 = vmatpush3.bf16.msra.mxu1 %v2187_v61 }
 0x2d9   : > { %2116 = vmatprep.subr.bf16.mxu1 %v2266_v17 }
 0x333   : > { %v1141_v7 = vpop.f32.mrb[0].mxu1 }
 0x334   : > { %v1148_v8 = vmul.f32 0.25, %v1141_v7  ;;  %v2080_v9 = vpop.f32.mrb[1].mxu1 }
 0x335   : > { %v1144_v10 = vpop.f32.mrb[2].mxu1 }
 0x336   : > { %v1149_v11 = vmul.f32 0.25, %v1144_v10  ;;  %v2081_v12 = vpop.f32.mrb[3].mxu1  ;;  %v1151_v13 = vsel %vm1150_vm7, %v1148_v8, -inf }
 0x337   : > { %1152 = vmax.xlane.f32.xlu1 %v1151_v13  ;;  %v1988_v12 = vld [vmem:[%s2738_s23] ss:$0 sm:$0xff] }
 0x338   : > { %v1155_v14 = vsel %vm1154_vm8, %v1149_v11, -inf }
 0x339   : > { %1156 = vmax.xlane.f32.xlu0 %v1155_v14 }
 0x3a6   : > { %v1270_v15 = vpop.f32.mrb[4].mxu1 }
 0x3a7   : > { %v1277_v16 = vmul.f32 0.25, %v1270_v15  ;;  %v2092_v18 = vpop.f32.mrb[5].mxu1 }
 0x3a8   : > { %v1273_v19 = vpop.f32.mrb[6].mxu1 }
 0x3a9   : > { %v1278_v20 = vmul.f32 0.25, %v1273_v19  ;;  %v2093_v21 = vpop.f32.mrb[7].mxu1  ;;  %v1279_v22 = vsel %vm1150_vm7, %v1277_v16, -inf }
 0x3aa   : > { %1280 = vmax.xlane.f32.xlu0 %v1279_v22 }
 0x3ab   : > { %v1282_v23 = vsel %vm1154_vm8, %v1278_v20, -inf }
 0x3ac   : > { %1283 = vmax.xlane.f32.xlu1 %v1282_v23 }
 0x3c4   : > { %v1153_v24 = vpop.xlane.xlu1 %1152 }
 0x3c5   : > { %v1158_v25 = vsub.f32 %v1148_v8, %v1153_v24 }
 0x3c6   : > { %v1157_v26 = vpop.xlane.xlu0 %1156 }
 0x3c7   : > { %v1160_v27 = vmul.f32 1.442695, %v1158_v25  ;;  %v1159_v28 = vsub.f32 %v1149_v11, %v1157_v26 }
 0x3c9   : > { %2202 = vpow2.f32 %v1160_v27  ;;  %v1162_v29 = vmul.f32 1.442695, %v1159_v28 }
 0x3cb   : > { %2204 = vpow2.f32 %v1162_v29 }
 0x3d3   : > { %v2203_v30 = vpop.eup %2202 }
 0x3d4   : > { %v1164_v31 = vsel %vm1150_vm7, %v2203_v30, 0.0 }
 0x3d5   : > { %v2205_v32 = vpop.eup %2204  ;;  %1165 = vadd.xlane.f32.xlu0 %v1164_v31 }
 0x3d6   : > { %v1167_v33 = vsel %vm1154_vm8, %v2205_v32, 0.0 }
 0x3d7   : > { %1168 = vadd.xlane.f32.xlu1 %v1167_v33  ;;  %v2189_v33 = vld [vmem:[%s2461_s16 + $0x8] sm:$0xff]  }
 0x437   : > { %v1281_v34 = vpop.xlane.xlu0 %1280 }
 0x438   : > { %v1285_v35 = vsub.f32 %v1277_v16, %v1281_v34 }
 0x439   : > { %v1284_v36 = vpop.xlane.xlu1 %1283 }
 0x43a   : > { %v1287_v37 = vmul.f32 1.442695, %v1285_v35  ;;  %v1286_v38 = vsub.f32 %v1278_v20, %v1284_v36 }
 0x43c   : > { %2206 = vpow2.f32 %v1287_v37  ;;  %v1289_v39 = vmul.f32 1.442695, %v1286_v38 }
 0x43e   : > { %2208 = vpow2.f32 %v1289_v39 }
 0x446   : > { %v2207_v40 = vpop.eup %2206 }
 0x447   : > { %v1291_v41 = vsel %vm1150_vm7, %v2207_v40, 0.0 }
 0x448   : > { %v2209_v42 = vpop.eup %2208  ;;  %1292 = vadd.xlane.f32.xlu0 %v1291_v41  ;;  %v1992_v41 = vld [vmem:[%s2740_s22] ss:$0 sm:$0xff] }
 0x449   : > { %v1294_v43 = vsel %vm1154_vm8, %v2209_v42, 0.0 }
 0x44a   : > { %1295 = vadd.xlane.f32.xlu1 %v1294_v43 }
 0x45e   : > { %1303 = vrot.lane.b32.xlu0 %v1099_v0, %s2268_s15  ;;  %s2741_s15 = sld [smem:[#allocation19_spill]] }
 0x462   : > { %v1166_v44 = vpop.xlane.xlu0 %1165 }
 0x463   : > { %2210 = vrcp.f32 %v1166_v44 }
 0x464   : > { %v1169_v45 = vpop.xlane.xlu1 %1168  ;;  %s2742_s28 = scalar_lea.vmem %s2741_s15, %s2396_s30 }
 0x465   : > { %2212 = vrcp.f32 %v1169_v45 }
 0x46d   : > { %v2211_v46 = vpop.eup %2210 }
 0x46e   : > { %v1172_v48 = vmul.f32 %v2211_v46, %v2203_v30  ;;  %v1993_v46 = vld [vmem:[%s811_s7] ss:$0 sm:$0xff] }
 0x46f   : > { %v2213_v47 = vpop.eup %2212 }
 0x470   : > { %v1173_v49 = vmul.f32 %v2213_v47, %v2205_v32  ;;  %v2188_v32 = vld [vmem:[%s2461_s16] sm:$0xff]  }
 0x472   : > { %v1174_v50 = vpack.c.bf16 %v1173_v49, %v1172_v48 }
 0x474   : > { %2085 = vmatmul.mubr.msk.bf16.vlgmr.msra.gmra.mrb[12].mxu0 %vm1150_vm7, %v1174_v50 }
 0x475   : > { %2096 = vmatprep.mubr.msk.bf16.mxu0 %vm2267_vm4, %v2266_v17 }
 0x4d5   : > { %v1293_v51 = vpop.xlane.xlu0 %1292 }
 0x4d6   : > { %2214 = vrcp.f32 %v1293_v51  ;;  %v2190_v51 = vld [vmem:[%s2475_s11] sm:$0xff]  }
 0x4d7   : > { %v1296_v52 = vpop.xlane.xlu1 %1295 }
 0x4d8   : > { %2216 = vrcp.f32 %v1296_v52  ;;  %v2191_v52 = vld [vmem:[%s2475_s11 + $0x8] sm:$0xff]  }
 0x4d9   : > { %v1304_v53 = vpop.permute.xlu0 %1303 }
 0x4da   : > { %v1309_v54 = vsel %vm1178_vm6, %v1304_v53, 0  ;;  %v2192_v53 = vld [vmem:[%s2475_s11 + $0x10] sm:$0xff]  }
 0x4db   : > { %2095 = vmatpush3.bf16.msra.mxu0 %v1309_v54  ;;  %v2193_v54 = vld [vmem:[%s2475_s11 + $0x18] sm:$0xff]  }
 0x4dc   : > { %2108 = vmatprep.subr.bf16.mxu0 %v2266_v17 }
 0x4e0   : > { %v2215_v55 = vpop.eup %2214 }
 0x4e1   : > { %v1299_v57 = vmul.f32 %v2215_v55, %v2207_v40  ;;  %v2194_v55 = vld [vmem:[%s2475_s11 + $0x20] sm:$0xff]  }
 0x4e2   : > { %v2217_v56 = vpop.eup %2216 }
 0x4e3   : > { %v1300_v58 = vmul.f32 %v2217_v56, %v2209_v42  ;;  %v2195_v56 = vld [vmem:[%s2475_s11 + $0x28] sm:$0xff]  }
 0x4e5   : > { %v1301_v59 = vpack.c.bf16 %v1300_v58, %v1299_v57  ;;  %v2196_v57 = vld [vmem:[%s2475_s11 + $0x30] sm:$0xff]   ;;  %v2197_v58 = vld [vmem:[%s2475_s11 + $0x38] sm:$0xff]  }
 0x4e7   : > { %2097 = vmatmul.mubr.msk.bf16.vlgmr.msra.gmra.mrb[16].mxu0 %vm1150_vm7, %v1301_v59  ;;  %v1994_v59 = vld [vmem:[%s2742_s28] ss:$0 sm:$0xff] }
 0x4e8   : > { %2112 = vmatprep.mubr.msk.bf16.mxu0 %vm2267_vm4, %v2266_v17  ;;  %2109 = vmatpush3.bf16.msra.mxu0 %v2188_v32 }
 0x4e9   : > { %2110 = vmatprep.subr.bf16.mxu0 %v2266_v17 }
 0x4ec   : > { %2111 = vmatpush3.bf16.msra.mxu0 %v2189_v33 }
 0x547   : > { %v1216_v62 = vpop.f32.mrb[12].mxu0 }
 0x548   : > { %v2086_v63 = vpop.f32.mrb[13].mxu0 }
 0x549   : > { %v1219_v0 = vpop.f32.mrb[14].mxu0 }
 0x54a   : > { %v1223_v1 = vpack.c.bf16 %v1219_v0, %v1216_v62  ;;  %v2087_v4 = vpop.f32.mrb[15].mxu0 }
 0x5ba   : > { %v1345_v5 = vpop.f32.mrb[16].mxu0 }
 0x5bb   : > { %v2098_v6 = vpop.f32.mrb[17].mxu0 }
 0x5bc   : > { %v1348_v7 = vpop.f32.mrb[18].mxu0 }
 0x5bd   : > { %v1352_v8 = vpack.c.bf16 %v1348_v7, %v1345_v5  ;;  %v2099_v9 = vpop.f32.mrb[19].mxu0 }
 0x5bf   : > { %1354 = vrot.lane.b32.xlu1 %v1352_v8, %s2269_s4 }
 0x631   : > { %v1355_v10 = vpop.permute.xlu1 %1354 }
 0x632   : > { %v1358_v11 = vsel %vm1100_vm5, %v1223_v1, %v1355_v10 }
 0x633   : > { %2105 = vmatmul.mubr.msk.bf16.vlgmr.msra.gmra.mrb[8].mxu1 %vm856_vm2, %v1358_v11 }
 0x634   : > { %2132 = vmatprep.mubr.msk.bf16.mxu1 %vm2267_vm4, %v2266_v17  ;;  %2117 = vmatpush3.bf16.msra.mxu1 %v2190_v51 }
 0x635   : > { %2118 = vmatprep.subr.bf16.mxu1 %v2266_v17 }
 0x638   : > { %2119 = vmatpush3.bf16.msra.mxu1 %v2191_v52 }
 0x639   : > { %2120 = vmatprep.subr.bf16.mxu1 %v2266_v17 }
 0x63c   : > { %2121 = vmatpush3.bf16.msra.mxu1 %v2192_v53 }
 0x63d   : > { %2122 = vmatprep.subr.bf16.mxu1 %v2266_v17 }
 0x640   : > { %2123 = vmatpush3.bf16.msra.mxu1 %v2193_v54 }
 0x641   : > { %2124 = vmatprep.subr.bf16.mxu1 %v2266_v17 }
 0x644   : > { %2125 = vmatpush3.bf16.msra.mxu1 %v2194_v55 }
 0x645   : > { %2126 = vmatprep.subr.bf16.mxu1 %v2266_v17 }
 0x648   : > { %2127 = vmatpush3.bf16.msra.mxu1 %v2195_v56 }
 0x649   : > { %2128 = vmatprep.subr.bf16.mxu1 %v2266_v17 }
 0x64c   : > { %2129 = vmatpush3.bf16.msra.mxu1 %v2196_v57 }
 0x64d   : > { %2130 = vmatprep.subr.bf16.mxu1 %v2266_v17 }
 0x650   : > { %2131 = vmatpush3.bf16.msra.mxu1 %v2197_v58 }
 0x706   : > { %v1418_v13 = vpop.f32.mrb[8].mxu1 }
 0x707   : > { %v1419_v14 = vadd.f32 %v1988_v12, %v1418_v13  ;;  %v2106_v15 = vpop.f32.mrb[9].mxu1 }
 0x708   : > { %v1421_v16 = vpop.f32.mrb[10].mxu1 }
 0x709   : > { %v2597_v18 = vadd.f32 %v1419_v14, %v2488_v2  ;;  %v1422_v19 = vadd.f32 %v1988_v12, %v1421_v16  ;;  %v2107_v20 = vpop.f32.mrb[11].mxu1 }
 0x70b   : > { %v2600_v21 = vadd.f32 %v1422_v19, %v2490_v3  ;;  %v1429_v22 = vsel %vm856_vm2, %v2597_v18, 0.0 }
 0x70c   : > { %1430 = vadd.xlane.f32.xlu1 %v1429_v22 }
 0x70d   : > { %v1432_v23 = vsel %vm860_vm3, %v2600_v21, 0.0 }
 0x70e   : > { %1433 = vadd.xlane.f32.xlu0 %v1432_v23 }
 0x799   : > { %v1431_v24 = vpop.xlane.xlu1 %1430 }
 0x79a   : > { %v1435_v25 = vmul.f32 0.03125, %v1431_v24 }
 0x79b   : > { %v1434_v26 = vpop.xlane.xlu0 %1433 }
 0x79c   : > { %v1437_v2 = vsub.f32 %v2597_v18, %v1435_v25  ;;  %v1436_v27 = vmul.f32 0.03125, %v1434_v26  ;;  %v1998_v25 = vld [vmem:[%s827_s10] ss:$0 sm:$0xff] }
 0x79e   : > { %v1438_v28 = vsub.f32 %v2600_v21, %v1436_v27  ;;  %v1439_v3 = vmul.f32 %v1437_v2, %v1437_v2 }
 0x7a0   : > { %v1441_v29 = vsel %vm856_vm2, %v1439_v3, 0.0  ;;  %v1440_v30 = vmul.f32 %v1438_v28, %v1438_v28 }
 0x7a1   : > { %1442 = vadd.xlane.f32.xlu0 %v1441_v29 }
 0x7a2   : > { %v1444_v31 = vsel %vm860_vm3, %v1440_v30, 0.0 }
 0x7a3   : > { %1445 = vadd.xlane.f32.xlu1 %v1444_v31 }
 0x82e   : > { %v1443_v34 = vpop.xlane.xlu0 %1442 }
 0x82f   : > { %v1447_v35 = vmul.f32 0.03125, %v1443_v34 }
 0x830   : > { %v1446_v36 = vpop.xlane.xlu1 %1445 }
 0x831   : > { %v1449_v37 = vadd.f32 1e-06, %v1447_v35  ;;  %v1448_v38 = vmul.f32 0.03125, %v1446_v36 }
 0x833   : > { %2218 = vrsqrt.f32 %v1449_v37  ;;  %v1450_v39 = vadd.f32 1e-06, %v1448_v38 }
 0x835   : > { %2220 = vrsqrt.f32 %v1450_v39 }
 0x83d   : > { %v2219_v40 = vpop.eup %2218 }
 0x83e   : > { %v1453_v42 = vmul.f32 %v2219_v40, %v1437_v2 }
 0x83f   : > { %v2221_v43 = vpop.eup %2220 }
 0x840   : > { %v1461_v44 = vmul.f32 %v1992_v41, %v1453_v42  ;;  %v1454_v45 = vmul.f32 %v2221_v43, %v1438_v28 }
 0x842   : > { %v1462_v47 = vmul.f32 %v1992_v41, %v1454_v45  ;;  %v1469_v48 = vadd.f32 %v1993_v46, %v1461_v44 }
 0x844   : > { %v1470_v49 = vadd.f32 %v1993_v46, %v1462_v47 }
 0x846   : > { %v1471_v50 = vpack.c.bf16 %v1470_v49, %v1469_v48 }
 0x848   : > { %2113 = vmatmul.mubr.msk.bf16.vlgmr.msra.gmra.mrb[20].mxu0 %vm856_vm2, %v1471_v50 }
 0x91b   : > { %v1532_v60 = vpop.f32.mrb[20].mxu0 }
 0x91c   : > { %v1533_v61 = vadd.f32 %v1994_v59, %v1532_v60  ;;  %v2114_v62 = vpop.f32.mrb[21].mxu0 }
 0x91d   : > { %v1535_v63 = vpop.f32.mrb[22].mxu0 }
 0x91e   : > { %v1539_v0 = vmul.f32 %v1533_v61, %v1533_v61  ;;  %v1536_v1 = vadd.f32 %v1994_v59, %v1535_v63  ;;  %v2115_v4 = vpop.f32.mrb[23].mxu0 }
 0x920   : > { %v1541_v5 = vmul.f32 %v1539_v0, %v1533_v61  ;;  %v1540_v6 = vmul.f32 %v1536_v1, %v1536_v1 }
 0x922   : > { %v1543_v7 = vmul.f32 0.044715, %v1541_v5  ;;  %v1542_v8 = vmul.f32 %v1540_v6, %v1536_v1 }
 0x924   : > { %v1545_v9 = vadd.f32 %v1543_v7, %v1533_v61  ;;  %v1544_v17 = vmul.f32 0.044715, %v1542_v8 }
 0x926   : > { %v1547_v10 = vmul.f32 0.7978846, %v1545_v9  ;;  %v1546_v11 = vadd.f32 %v1544_v17, %v1536_v1 }
 0x928   : > { %2222 = vtanh.f32 %v1547_v10  ;;  %v1548_v12 = vmul.f32 0.7978846, %v1546_v11 }
 0x92a   : > { %2224 = vtanh.f32 %v1548_v12 }
 0x932   : > { %v2223_v13 = vpop.eup %2222 }
 0x933   : > { %v1551_v14 = vadd.f32 1.0, %v2223_v13 }
 0x934   : > { %v2225_v15 = vpop.eup %2224 }
 0x935   : > { %v1553_v16 = vmul.f32 0.5, %v1551_v14  ;;  %v1552_v19 = vadd.f32 1.0, %v2225_v15 }
 0x937   : > { %v1554_v20 = vmul.f32 0.5, %v1552_v19  ;;  %v1555_v22 = vmul.f32 %v1553_v16, %v1533_v61 }
 0x939   : > { %v1556_v23 = vmul.f32 %v1554_v20, %v1536_v1 }
 0x93b   : > { %v1557_v24 = vpack.c.bf16 %v1556_v23, %v1555_v22 }
 0x93d   : > { %2133 = vmatmul.mubr.bf16.vlgmr.msra.gmra.mrb[12].mxu1 %v1557_v24 }
 0xa10   : > { %v1663_v26 = vpop.f32.mrb[12].mxu1 }
 0xa11   : > { %v1664_v2 = vadd.f32 %v1998_v25, %v1663_v26  ;;  %v2134_v27 = vpop.f32.mrb[13].mxu1  ;;  %1679 = sbr.rel (!%p1676_p12) target bundleno = 2586 (0xa1a), region = 96 }
 0xa12   : > { %v1666_v28 = vpop.f32.mrb[14].mxu1 }
 0xa13   : > { %v1670_v3 = vadd.f32 %v1664_v2, %v2597_v18  ;;  %v1667_v29 = vadd.f32 %v1998_v25, %v1666_v28  ;;  %v2135_v30 = vpop.f32.mrb[15].mxu1 }
 0xa15   : > { %1672 = vst.msk [vmem:[#allocation2] sm:$0xff] %vm856_vm2, %v1670_v3  ;;  %v1671_v31 = vadd.f32 %v1667_v29, %v2600_v21  ;;  %v2018_v32 = vpack.c.bf16 (%p1676_p12), %v1670_v3, %v1670_v3 }
 0xa17   : > { %1673 = vst.msk [vmem:[#allocation2 + $0x8] sm:$0x3] %vm860_vm3, %v1671_v31  ;;  %v2019_v33 = vpack.c.bf16 (%p1676_p12), %v1671_v31, %v1671_v31 }
 0xa18   : > { %1689 = vst.msk [vmem:[%s2483_s9] sm:$0xf] %vm1688_vm9, %v2018_v32 }
 0xa19   : > { %1691 = vst.msk [vmem:[%s2483_s9 + $0x4] sm:$0x1] %vm1690_vm10, %v2019_v33 }
 0xa1a PF: > { %s2744_s10 = sld [smem:[#allocation5_spill]]  ;;  %s2745_s24 = sld [smem:[#allocation3_spill]] }
 0xa1b   : > { %s2746_s25 = sld [smem:[#allocation4_spill]]  ;;  %s2747_s26 = sld [smem:[#allocation6_spill]] }
 0xa1c   : > { %s2748_s27 = sld [smem:[#allocation7_spill]] }
 0xa20   : > { %s27_s28 = sadd.s32 1, %s2744_s10  }
 0xa21   : > { %p24_p13 = scmp.ge.s32.totalorder %s27_s28, 10  }
 0xa23   :  { %26 = sbr.rel (!%p24_p13) target bundleno = 15 (0xf), region = 174 }

// kernel: eq.11
= control target key start
LH: loop header
LB: loop body
LE: loop exit
PB: predicated region body
PF: predicated region fallthrough
CT: control target
= control target key end

     0   :  { %vm9_vm0 = vcmask 15360   ;;  %vm36_vm1 = vcmask 48128   ;;  %vm22_vm2 = vcmask 31744   ;;  %vm50_vm3 = vcmask 64512   ;;  %s165_s18 = smov 126   ;;  %s166_s23 = smov 122   ;;  %s298_s0 = inlined_call_operand.vmem [shape: s32[14,42], index: 0, kind: input, shape index: {}]   ;;  %s299_s1 = inlined_call_operand.vmem [shape: s32[588], index: 1, kind: output, shape index: {}]  }
   0x1   :  { %v121_v0 = vld [vmem:[%s298_s0 + $0x3] sm:$0x1]   ;;  %v128_v2 = vld [vmem:[%s298_s0 + $0x9] sm:$0x1]   ;;  %v124_v5 = vld [vmem:[%s298_s0 + $0x6] sm:$0x1]  }
   0x2   :  { %v122_v1 = vld [vmem:[%s298_s0 + $0x3] sm:$0x1]   ;;  %v129_v4 = vld [vmem:[%s298_s0 + $0x9] sm:$0x1]   ;;  %v125_v6 = vld [vmem:[%s298_s0 + $0x6] sm:$0x1]  }
   0x3   :  { %v10_v3 = vsel %vm9_vm0, %v122_v1, %v121_v0  ;;  %v37_v7 = vsel %vm36_vm1, %v129_v4, %v128_v2  ;;  %v132_v8 = vld [vmem:[%s298_s0 + $0xc] sm:$0x1]   ;;  %v23_v10 = vsel %vm22_vm2, %v125_v6, %v124_v5  ;;  %s167_s24 = smov 124   ;;  %s168_s25 = smov 120   ;;  %v136_v12 = vld [vmem:[%s298_s0 + $0x2] sm:$0x1]  }
   0x4   :  { %11 = vrot.lane.b32.xlu0 %v10_v3, %s165_s18  ;;  %v133_v9 = vld [vmem:[%s298_s0 + $0xc] sm:$0x1]   ;;  %38 = vrot.lane.b32.xlu1 %v37_v7, %s166_s23  ;;  %vm3_vm4 = vcmask 343040   ;;  %v137_v13 = vld [vmem:[%s298_s0 + $0x5] sm:$0x1]   ;;  %s169_s5 = smov 84  }
   0x5   :  { %v51_v11 = vsel %vm50_vm3, %v133_v9, %v132_v8  ;;  %v2_v14 = vld [vmem:[%s298_s0] sm:$0x1]   ;;  %s170_s6 = smov 82   ;;  %v139_v15 = vld [vmem:[%s298_s0 + $0x8] sm:$0x1]   ;;  %s171_s11 = smov 80  }
   0x6   :  { %4 = vst.msk [vmem:[%s299_s1] sm:$0x1] %vm3_vm4, %v2_v14   ;;  %v141_v16 = vld [vmem:[%s298_s0 + $0xb] sm:$0x1]   ;;  %s172_s12 = smov 78   ;;  %s173_s17 = smov 42  }
   0x7   :  { %v143_v17 = vld [vmem:[%s298_s0 + $0x1] sm:$0x1]   ;;  %v144_v18 = vld [vmem:[%s298_s0 + $0x4] sm:$0x1]   ;;  %s174_s18 = smov 40   ;;  %s175_s23 = smov 38  }
   0x8   :  { %24 = vrot.lane.b32.xlu0 %v23_v10, %s167_s24  ;;  %52 = vrot.lane.b32.xlu1 %v51_v11, %s168_s25  ;;  %v146_v19 = vld [vmem:[%s298_s0 + $0x7] sm:$0x1]   ;;  %v148_v20 = vld [vmem:[%s298_s0 + $0xa] sm:$0x1]   ;;  %s176_s24 = smov 36   ;;  %vm13_vm5 = vcmask 326656  }
   0x9   :  { %v150_v21 = vld [vmem:[%s298_s0 + $0xd] sm:$0x1]   ;;  %s177_s0 = smov 34   ;;  %vm16_vm6 = vcmask 1048560   ;;  %vm40_vm7 = vcmask 293888   ;;  %vm26_vm8 = vcmask 310272  }
   0xa   :  { %vm29_vm9 = vcmask 1048544   ;;  %vm43_vm10 = vcmask 1048528   ;;  %vm54_vm11 = vcmask 277504   ;;  %vm57_vm12 = vcmask 1048512  }
   0xb   :  { %vm64_vm13 = vcmask 1031840   ;;  %vm70_vm14 = vcmask 1015440   ;;  %vm77_vm15 = vcmask 999040   ;;  %vm84_vm0 = vcmask 982640  }
   0xc   :  { %62 = vrot.lane.b32.xlu0 %v136_v12, %s169_s5  ;;  %68 = vrot.lane.b32.xlu1 %v137_v13, %s170_s6  ;;  %vm91_vm1 = vcmask 687440   ;;  %vm97_vm2 = vcmask 671040   ;;  %vm104_vm3 = vcmask 654640   ;;  %vm111_vm4 = vcmask 638240  }
  0x10   :  { %75 = vrot.lane.b32.xlu0 %v139_v15, %s171_s11  ;;  %82 = vrot.lane.b32.xlu1 %v141_v16, %s172_s12 }
  0x14   :  { %89 = vrot.lane.b32.xlu0 %v143_v17, %s173_s17  ;;  %95 = vrot.lane.b32.xlu1 %v144_v18, %s174_s18 }
  0x18   :  { %102 = vrot.lane.b32.xlu0 %v146_v19, %s175_s23  ;;  %109 = vrot.lane.b32.xlu1 %v148_v20, %s176_s24 }
  0x1c   :  { %116 = vrot.lane.b32.xlu0 %v150_v21, %s177_s0 }
  0x76   :  { %v12_v22 = vpop.permute.xlu0 %11   ;;  %v39_v23 = vpop.permute.xlu1 %38  }
  0x77   :  { %123 = vst.msk [vmem:[%s299_s1 + $0x1] sm:$0x1] %vm13_vm5, %v12_v22   ;;  %vm118_vm5 = vcmask 621840  }
  0x78   :  { %17 = vst.msk [vmem:[%s299_s1] sm:$0x1] %vm16_vm6, %v12_v22  }
  0x79   :  { %130 = vst.msk [vmem:[%s299_s1 + $0x3] sm:$0x1] %vm40_vm7, %v39_v23  }
  0x7a   :  { %v25_v24 = vpop.permute.xlu0 %24   ;;  %v53_v25 = vpop.permute.xlu1 %52  }
  0x7b   :  { %126 = vst.msk [vmem:[%s299_s1 + $0x2] sm:$0x1] %vm26_vm8, %v25_v24  }
  0x7c   :  { %127 = vst.msk [vmem:[%s299_s1 + $0x1] sm:$0x1] %vm29_vm9, %v25_v24  }
  0x7d   :  { %131 = vst.msk [vmem:[%s299_s1 + $0x2] sm:$0x1] %vm43_vm10, %v39_v23  }
  0x7e   :  { %134 = vst.msk [vmem:[%s299_s1 + $0x4] sm:$0x1] %vm54_vm11, %v53_v25   ;;  %v63_v26 = vpop.permute.xlu0 %62   ;;  %v69_v27 = vpop.permute.xlu1 %68  }
  0x7f   :  { %135 = vst.msk [vmem:[%s299_s1 + $0x3] sm:$0x1] %vm57_vm12, %v53_v25  }
  0x80   :  { %65 = vst.msk [vmem:[%s299_s1] sm:$0x1] %vm64_vm13, %v63_v26  }
  0x81   :  { %138 = vst.msk [vmem:[%s299_s1 + $0x1] sm:$0x1] %vm70_vm14, %v69_v27  }
  0x82   :  { %v76_v28 = vpop.permute.xlu0 %75   ;;  %v83_v29 = vpop.permute.xlu1 %82  }
  0x83   :  { %140 = vst.msk [vmem:[%s299_s1 + $0x2] sm:$0x1] %vm77_vm15, %v76_v28  }
  0x84   :  { %142 = vst.msk [vmem:[%s299_s1 + $0x3] sm:$0x1] %vm84_vm0, %v83_v29  }
  0x86   :  { %v90_v30 = vpop.permute.xlu0 %89   ;;  %v96_v31 = vpop.permute.xlu1 %95  }
  0x87   :  { %92 = vst.msk [vmem:[%s299_s1] sm:$0x1] %vm91_vm1, %v90_v30  }
  0x88   :  { %145 = vst.msk [vmem:[%s299_s1 + $0x1] sm:$0x1] %vm97_vm2, %v96_v31  }
  0x8a   :  { %v103_v32 = vpop.permute.xlu0 %102   ;;  %v110_v33 = vpop.permute.xlu1 %109  }
  0x8b   :  { %147 = vst.msk [vmem:[%s299_s1 + $0x2] sm:$0x1] %vm104_vm3, %v103_v32  }
  0x8c   :  { %149 = vst.msk [vmem:[%s299_s1 + $0x3] sm:$0x1] %vm111_vm4, %v110_v33  }
  0x8e   :  { %v117_v34 = vpop.permute.xlu0 %116  }
  0x8f   :  { %151 = vst.msk [vmem:[%s299_s1 + $0x4] sm:$0x1] %vm118_vm5, %v117_v34  }

// kernel: forward.5
= control target key start
LH: loop header
LB: loop body
LE: loop exit
PB: predicated region body
PF: predicated region fallthrough
CT: control target
= control target key end

     0   :  { %s1833_s23 = smov 0   ;;  %s1835_s24 = smov 0   ;;  %s2047_s0 = inlined_call_operand.vmem [shape: bf16[2,3,3,32], index: 0, kind: input, shape index: {}]   ;;  %s2048_s1 = inlined_call_operand.vmem [shape: bf16[2,3,3,32], index: 1, kind: input, shape index: {}]   ;;  %s2049_s2 = inlined_call_operand.vmem [shape: bf16[16,32], index: 2, kind: input, shape index: {}]   ;;  %s2050_s3 = inlined_call_operand.vmem [shape: bf16[16,32], index: 3, kind: input, shape index: {}]   ;;  %s2051_s4 = inlined_call_operand.vmem [shape: f32[16,1], index: 4, kind: input, shape index: {}]   ;;  %s2052_s5 = inlined_call_operand.vmem [shape: bf16[32,16], index: 5, kind: input, shape index: {}]   ;;  %s2053_s6 = inlined_call_operand.vmem [shape: bf16[32,3], index: 6, kind: input, shape index: {}]   ;;  %s2054_s7 = inlined_call_operand.vmem [shape: f32[32,1], index: 7, kind: input, shape index: {}]   ;;  %s2055_s8 = inlined_call_operand.vmem [shape: f32[32,1], index: 8, kind: input, shape index: {}]   ;;  %s2056_s9 = inlined_call_operand.<no memory space> [shape: f32[1,1], index: 9, kind: input, shape index: {}]   ;;  %s2057_s10 = inlined_call_operand.vmem [shape: bf16[3,588], index: 10, kind: input, shape index: {}]   ;;  %s2058_s11 = inlined_call_operand.vmem [shape: bf16[2,3,3,588], index: 11, kind: input, shape index: {}]   ;;  %s2059_s12 = inlined_call_operand.vmem [shape: f32[2,3,1,588], index: 12, kind: output, shape index: {}]  }
   0x1   :  { %v17_v0 = vstv %s2056_s9  ;;  %s1837_s25 = smov 0   ;;  %s1839_s26 = smov 0  }
   0x2   :  { %18 = vst [vmem:[#allocation2] sm:$0x1] %v17_v0  ;;  %s1841_s27 = smov 0  }
   0x3 LB: > { %s33_s9 = sadd.s32 1, %s1749_s25  ;;  %s36_s28 = sadd.s32 1, %s1753_s26  ;;  %s1757_s27 = sphi %s1841_s27, %s24_s27   ;;  %s1753_s26 = sphi %s1839_s26, %s2065_s26   ;;  %s1749_s25 = sphi %s1837_s25, %s2064_s25   ;;  %s1745_s24 = sphi %s1835_s24, %s2063_s24   ;;  %s1741_s23 = sphi %s1833_s23, %s2062_s23  }
   0x4   : > { %p34_p0 = scmp.ge.s32.totalorder %s33_s9, 3  ;;  %p1538_p1 = scmp.ge.s32.totalorder %s1757_s27, 1 }
   0x5   : > { %p414_p2 = scmp.lt.s32.totalorder %s1757_s27, 7 }
   0x6   : > { %s2067_s9 = smov (%p34_p0, %s33_s9), 0  ;;  %s2069_s28 = smov (!%p34_p0, %s36_s28), %s1753_s26 }
   0x7   : > { %p415_p3 = pnand %p1538_p1, %p414_p2  ;;  %p38_p4 = scmp.ge.s32.totalorder %s2069_s28, 2 }
   0x8   : > { %p479_p5 = scmp.lt.s32.totalorder (!%p415_p3), %s1745_s24, 1  ;;  %p481_p6 = scmp.lt.s32.totalorder (!%p415_p3), %s1741_s23, 2  ;;  %v1759_v1 = vmov (!%p415_p3), 0.0   ;;  %vm1760_vm0 = vmmov (!%p415_p3), 0   ;;  %v624_v2 = vld [vmem:[%s2051_s4] sm:$0xff] (!%p415_p3)  ;;  %v1761_v3 = vmov (!%p415_p3), 0   ;;  %v753_v17 = vlaneseq (!%p415_p3) }
   0x9   : > { %s2071_s28 = smov (%p38_p4, %s2069_s28), 0  ;;  %418 = sbr.rel (%p415_p3) target bundleno = 794 (0x31a), region = 68 }
   0xa   : > { %2060 = sst [smem:[#allocation3_spill]] %s2071_s28  ;;  %1586 = vmatprep.subr.bf16.mxu0 (!%p415_p3), %v1759_v1  ;;  %1592 = vmatprep.subr.bf16.mxu1 (!%p415_p3), %v1759_v1  ;;  %v625_v4 = vld [vmem:[%s2051_s4 + $0x8] sm:$0xff] (!%p415_p3)  ;;  %vm524_vm1 = vcmask (!%p415_p3), 261120   ;;  %v1158_v6 = vld [vmem:[%s2054_s7 + $0x10] sm:$0xff] (!%p415_p3)  ;;  %v1220_v10 = vld [vmem:[%s2055_s8] sm:$0xff] (!%p415_p3)  ;;  %v1900_v19 = vshrl.u32 (!%p415_p3), %v753_v17, 7 }
   0xb   : > { %1588 = vmatprep.mubr.msk.bf16.mxu0 (!%p415_p3), %vm1760_vm0, %v1759_v1  ;;  %1594 = vmatprep.mubr.msk.bf16.mxu1 (!%p415_p3), %vm1760_vm0, %v1759_v1  ;;  %v1687_v11 = vld [vmem:[%s2050_s3] sm:$0xff] (!%p415_p3)   ;;  %v1222_v13 = vld [vmem:[%s2055_s8 + $0x10] sm:$0xff] (!%p415_p3)  ;;  %v1762_v15 = vmov (!%p415_p3), 1983009808   ;;  %vm671_vm2 = vcmask (!%p415_p3), 130048   ;;  %vm780_vm3 = vcmask (!%p415_p3), 1040384  }
   0xc   : > { %1685 = vset.pattern.permute.xlu0 (!%p415_p3), %v1761_v3  ;;  %1686 = vset.pattern.permute.xlu1 (!%p415_p3), %v1761_v3  ;;  %v1688_v12 = vld [vmem:[%s2049_s2] sm:$0xff] (!%p415_p3)   ;;  %v751_v16 = vunpack.c.l.s4 (!%p415_p3), %v1762_v15  ;;  %vm781_vm4 = vcmask (!%p415_p3), 1041408   ;;  %v1763_v23 = vmov (!%p415_p3), 65535   ;;  %vm773_vm5 = vcmask (!%p415_p3), 23552   ;;  %v1693_v33 = vld [vmem:[%s2053_s6 + $0x8] sm:$0xff] (!%p415_p3)  }
   0xd   : > { %628 = vperm.xlu0 (!%p415_p3), %1685, %v624_v2   ;;  %v1314_v14 = vld [vmem:[#allocation2] sm:$0x1] (!%p415_p3)  ;;  %v782_v24 = vsel (!%p415_p3), %vm780_vm3, 4294967295, %v1763_v23  ;;  %vm1300_vm6 = vcmask (!%p415_p3), 621568   ;;  %vm1406_vm7 = vcmp.lt.s32.totalorder (!%p415_p3), %v753_v17, 588 }
   0xe   : > { %v752_v18 = vunpack.c.0.s8 (!%p415_p3), %v751_v16  ;;  %v1689_v20 = vld [vmem:[%s2052_s5] sm:$0xff] (!%p415_p3)   ;;  %v1914_v26 = vsel (!%p415_p3), %vm781_vm4, %v782_v24, 0  ;;  %v1559_v23 = vld.sshfl [vmem:[%s2057_s10 + $0x8] sm:$0x3 pattern:$0x76325410] (!%p415_p3) }
   0xf   : > { %v1691_v32 = vld [vmem:[%s2053_s6] sm:$0xff] (!%p415_p3)  }
  0x10   : > { %s2073_s24 = smov (!%p479_p5, %s1745_s24), 1  ;;  %s2075_s23 = smov (!%p481_p6, %s1741_s23), 2  ;;  %v1907_v21 = vsub.s32 %v752_v18, %v1900_v19  ;;  %v1156_v24 = vld [vmem:[%s2054_s7] sm:$0xff] }
  0x11   : > { %s1636_s13 = smul.u32 3, %s2073_s24  ;;  %633 = vperm.xlu0 %1685, %v625_v4   ;;  %1162 = vperm.xlu1 %1686, %v1156_v24  }
  0x12   : > { %s1637_s14 = smul.u32 5, %s2075_s23 }
  0x13   : > { %s484_s17 = sadd.s32 %s1636_s13, %s2075_s23  ;;  %s1638_s18 = smul.u32 15, %s2073_s24 }
  0x14   : > { %s1539_s19 = sshll.u32 %s484_s17, 1 }
  0x15   : > { %s494_s22 = scalar_lea.vmem %s2048_s1, %s1539_s19  ;;  %s1874_s29 = sadd.s32 %s1638_s18, %s1637_s14  ;;  %1172 = vperm.xlu0 %1685, %v1158_v6  }
  0x16   : > { %v518_v5 = vld [vmem:[%s494_s22] sm:$0x3]  ;;  %s486_s23 = scalar_lea.vmem %s2047_s0, %s1539_s19  ;;  %s1541_s21 = sshll.u32 %s1874_s29, 1 }
  0x17   : > { %v529_v7 = vsel %vm524_vm1, %v518_v5, 0  ;;  %v515_v8 = vld [vmem:[%s486_s23] sm:$0x3]  ;;  %s503_s23 = scalar_lea.vmem %s2058_s11, %s1541_s21  ;;  %s511_s21 = scalar_lea.vmem %s2059_s12, %s1874_s29 }
  0x18   : > { %1587 = vmatpush3.bf16.xpose.msra.mxu0 %v529_v7  ;;  %v581_v9 = vsel %vm524_vm1, %v515_v8, 0  ;;  %v735_v22 = vld [vmem:[%s503_s23] sm:$0xff]  ;;  %v1552_v27 = vld.sshfl [vmem:[%s503_s23 + $0x8] sm:$0x3 pattern:$0x76325410] }
  0x19   : > { %1593 = vmatpush3.bf16.xpose.msra.mxu1 %v581_v9  ;;  %1226 = vperm.xlu0 %1685, %v1220_v10   ;;  %v756_v25 = vrot.slane %v735_v22, %v1907_v21  ;;  %v797_v31 = vand.u32 %v1552_v27, %v1914_v26  ;;  %v749_v58 = vcombine.high %v735_v22, %v735_v22  ;;  %v1690_v8 = vld [vmem:[%s2052_s5 + $0x8] sm:$0xff]   ;;  %v729_v10 = vld [vmem:[%s2057_s10] sm:$0xff]  ;;  %v1159_v27 = vld [vmem:[%s2054_s7 + $0x18] sm:$0xff] }
  0x1b   : > { %v764_v28 = vcombine.high %v756_v25, %v756_v25  ;;  %v785_v29 = vand.u32 %v1914_v26, %v756_v25  ;;  %v763_v61 = vrot.slane %v749_v58, %v1907_v21  ;;  %v1157_v25 = vld [vmem:[%s2054_s7 + $0x8] sm:$0xff] }
  0x1c   : > { %1167 = vperm.xlu1 %1686, %v1157_v25  }
  0x1d   : > { %1236 = vperm.xlu0 %1685, %v1222_v13   ;;  %v788_v30 = vand.u32 %v1914_v26, %v764_v28  ;;  %v765_v2 = vcombine.high %v763_v61, %v763_v61  ;;  %v791_v9 = vand.u32 %v1914_v26, %v763_v61  ;;  %v1223_v28 = vld [vmem:[%s2055_s8 + $0x18] sm:$0xff] }
  0x1f   : > { %1589 = vmatmul.mubr.msk.bf16.vlgmr.msra.gmra.mrb[0].mxu0 %vm524_vm1, %v1687_v11  ;;  %799 = vmatprep.subr.bf16.mxu1 %v788_v30  ;;  %v794_v7 = vand.u32 %v1914_v26, %v765_v2  ;;  %v956_v11 = vcombine.high %v729_v10, %v729_v10 }
  0x20   : > { %1595 = vmatmul.mubr.msk.bf16.vlgmr.msra.gmra.mrb[0].mxu1 %vm524_vm1, %v1688_v12  ;;  %1600 = vmatprep.mubr.msk.bf16.mxu0 %vm671_vm2, %v1689_v20  ;;  %v963_v12 = vrot.slane %v729_v10, %v1907_v21 }
  0x21   : > { %831 = vmatprep.mubr.bf16.mxu1 %v1761_v3  ;;  %1317 = vperm.xlu0 %1685, %v1314_v14   ;;  %v970_v13 = vrot.slane %v956_v11, %v1907_v21  ;;  %v999_v21 = vand.u32 %v1559_v23, %v1914_v26 }
  0x22   : > { %800 = vmatpush1.bf16.msra.mxu1 %v785_v29  ;;  %v971_v14 = vcombine.high %v963_v12, %v963_v12  ;;  %v987_v20 = vand.u32 %v963_v12, %v1914_v26  ;;  %1177 = vperm.xlu1 %1686, %v1159_v27  }
  0x23   : > { %1604 = vmatprep.subr.bf16.mxu1 %v797_v31  ;;  %v972_v15 = vcombine.high %v970_v13, %v970_v13  ;;  %v993_v22 = vand.u32 %v970_v13, %v1914_v26 }
  0x24   : > { %v990_v16 = vand.u32 %v971_v14, %v1914_v26 }
  0x25   : > { %v996_v18 = vand.u32 %v972_v15, %v1914_v26  ;;  %v1221_v26 = vld [vmem:[%s2055_s8 + $0x8] sm:$0xff] }
  0x26   : > { %1231 = vperm.xlu1 %1686, %v1221_v26  }
  0x28   : > { %1553 = vmatmul.mubr.msk.bf16.vlgmr.msra.gmra.mrb[4].mxu1 %vm773_vm5, %v1691_v32 }
  0x29   : > { %1605 = vmatpush3.bf16.msra.mxu1 %v797_v31  ;;  %841 = vmatprep.mubr.bf16.mxu1 %v1761_v3 }
  0x2a   : > { %1001 = vmatprep.subr.bf16.mxu1 %v990_v16  ;;  %1241 = vperm.xlu1 %1686, %v1223_v28  }
  0x30   : > { %1554 = vmatmul.mubr.msk.bf16.gmra.mrb[8].mxu1 %vm773_vm5, %v1693_v33 }
  0x31   : > { %1606 = vmatprep.mubr.msk.bf16.mxu1 %vm773_vm5, %v1691_v32 }
  0x38   : > { %1607 = vmatmul.mubr.msk.bf16.vlgmr.msra.gmra.mrb[12].mxu1 %vm773_vm5, %v1693_v33 }
  0x39   : > { %1033 = vmatprep.mubr.bf16.mxu1 %v1761_v3  ;;  %1002 = vmatpush1.bf16.msra.mxu1 %v987_v20 }
  0x3a   : > { %1610 = vmatprep.subr.bf16.mxu1 %v999_v21 }
  0x8c   : > { %v629_v34 = vpop.permute.xlu0 %628 }
  0x90   : > { %v634_v46 = vpop.permute.xlu0 %633 }
  0xf2   : > { %v565_v35 = vpop.f32.mrb[0].mxu0 }
  0xf3   : > { %v1590_v36 = vpop.f32.mrb[1].mxu0  ;;  %v617_v37 = vpop.f32.mrb[0].mxu1 }
  0xf4   : > { %v568_v38 = vpop.f32.mrb[2].mxu0  ;;  %v618_v39 = vadd.f32 %v617_v37, %v565_v35  ;;  %v1596_v40 = vpop.f32.mrb[1].mxu1 }
  0xf5   : > { %v1591_v41 = vpop.f32.mrb[3].mxu0  ;;  %v620_v42 = vpop.f32.mrb[2].mxu1 }
  0xf6   : > { %v636_v43 = vadd.f32 %v629_v34, %v618_v39  ;;  %v621_v44 = vadd.f32 %v620_v42, %v568_v38  ;;  %v1597_v45 = vpop.f32.mrb[3].mxu1  ;;  %v1979_v35 = vpop.permute.xlu1 %1162 }
  0xf7   : > { %v1983_v37 = vpop.permute.xlu0 %1172 }
  0xf8   : > { %v638_v47 = vmul.f32 %v636_v43, %v636_v43  ;;  %v637_v48 = vadd.f32 %v634_v46, %v621_v44 }
  0xfa   : > { %v640_v49 = vmul.f32 %v638_v47, %v636_v43  ;;  %v639_v50 = vmul.f32 %v637_v48, %v637_v48  ;;  %v1981_v36 = vpop.permute.xlu1 %1167 }
  0xfc   : > { %v642_v51 = vmul.f32 0.044715, %v640_v49  ;;  %v641_v52 = vmul.f32 %v639_v50, %v637_v48 }
  0xfe   : > { %v644_v53 = vadd.f32 %v642_v51, %v636_v43  ;;  %v643_v54 = vmul.f32 0.044715, %v641_v52  ;;  %v1985_v38 = vpop.permute.xlu1 %1177 }
 0x100   : > { %v646_v55 = vmul.f32 0.7978846, %v644_v53  ;;  %v645_v56 = vadd.f32 %v643_v54, %v637_v48 }
 0x102   : > { %v647_v57 = vmul.f32 0.7978846, %v645_v56  ;;  %1695 = vtanh.f32 %v646_v55 }
 0x104   : > { %1697 = vtanh.f32 %v647_v57 }
 0x10c   : > { %v1696_v59 = vpop.eup %1695 }
 0x10d   : > { %v650_v60 = vadd.f32 1.0, %v1696_v59 }
 0x10e   : > { %v1698_v62 = vpop.eup %1697 }
 0x10f   : > { %v651_v63 = vadd.f32 1.0, %v1698_v62  ;;  %v652_v0 = vmul.f32 0.5, %v650_v60  ;;  %v1995_v60 = vpop.permute.xlu0 %1226 }
 0x111   : > { %v653_v1 = vmul.f32 0.5, %v651_v63  ;;  %v654_v4 = vmul.f32 %v652_v0, %v636_v43  ;;  %v1997_v63 = vpop.permute.xlu1 %1231 }
 0x113   : > { %v655_v5 = vmul.f32 %v653_v1, %v637_v48 }
 0x115   : > { %v660_v6 = vpack.c.bf16 %v655_v5, %v654_v4 }
 0x117   : > { %1598 = vmatprep.subr.bf16.mxu0 %v660_v6 }
 0x118   : > { %1599 = vmatpush3.bf16.msra.mxu0 %v660_v6 }
 0x119   : > { %852 = vmatprep.subr.bf16.mxu0 %v794_v7 }
 0x11b   : > { %1601 = vmatmul.mubr.msk.bf16.vlgmr.msra.gmra.mrb[4].mxu0 %vm671_vm2, %v1690_v8 }
 0x11c   : > { %853 = vmatpush1.bf16.msra.mxu0 %v791_v9  ;;  %884 = vmatprep.mubr.bf16.mxu0 %v1761_v3 }
 0x11d   : > { %1054 = vmatprep.subr.bf16.mxu0 %v996_v18 }
 0x123   : > { %1555 = vmatmul.mubr.msk.bf16.vlgmr.msra.gmra.mrb[8].mxu0 %vm773_vm5, %v1691_v32 }
 0x124   : > { %894 = vmatprep.mubr.bf16.mxu0 %v1761_v3  ;;  %1055 = vmatpush1.bf16.msra.mxu0 %v993_v22 }
 0x12b   : > { %1556 = vmatmul.mubr.msk.bf16.gmra.mrb[12].mxu0 %vm773_vm5, %v1693_v33 }
 0x12c   : > { %1086 = vmatprep.mubr.bf16.mxu0 %v1761_v3 }
 0x1ee   : > { %v1602_v29 = vpop.f32.mrb[4].mxu0 }
 0x1ef   : > { %v712_v30 = vpop.f32.mrb[5].mxu0 }
 0x1f0   : > { %v1603_v31 = vpop.f32.mrb[6].mxu0 }
 0x1f1   : > { %v728_v32 = vpack.c.bf16 %v1603_v31, %v1602_v29  ;;  %v715_v33 = vpop.f32.mrb[7].mxu0  ;;  %v1237_v31 = vpop.permute.xlu0 %1236 }
 0x1f2   : > { %v727_v34 = vpack.c.bf16 %v715_v33, %v712_v30 }
 0x1f4   : > { %1560 = vmatmul.mubr.msk.bf16.vlgmr.msra.gmra.mrb[4].mxu1 %vm773_vm5, %v727_v34  ;;  %1562 = vmatmul.mubr.msk.bf16.vlgmr.msra.gmra.mrb[8].mxu0 %vm773_vm5, %v727_v34 }
 0x1f5   : > { %1611 = vmatpush3.bf16.msra.mxu1 %v999_v21  ;;  %1043 = vmatprep.mubr.bf16.mxu1 %v1761_v3 }
 0x1f6   : > { %1096 = vmatprep.mubr.bf16.mxu0 %v1761_v3 }
 0x1fc   : > { %1561 = vmatmul.mubr.msk.bf16.gmra.mrb[8].mxu1 %vm773_vm5, %v728_v32  ;;  %1563 = vmatmul.mubr.msk.bf16.gmra.mrb[12].mxu0 %vm773_vm5, %v728_v32 }
 0x1fd   : > { %1612 = vmatprep.mubr.msk.bf16.mxu1 %vm773_vm5, %v727_v34 }
 0x204   : > { %1613 = vmatmul.mubr.msk.bf16.vlgmr.msra.gmra.mrb[12].mxu1 %vm773_vm5, %v728_v32 }
 0x2c7   : > { %v1035_v39 = vpop.f32.mrb[4].mxu1  ;;  %v1088_v40 = vpop.f32.mrb[8].mxu0 }
 0x2c8   : > { %v1180_v3 = vadd.f32 %v1979_v35, %v1035_v39  ;;  %v1182_v41 = vadd.f32 %v1979_v35, %v1088_v40  ;;  %v1037_v42 = vpop.f32.mrb[5].mxu1  ;;  %v1090_v43 = vpop.f32.mrb[9].mxu0 }
 0x2c9   : > { %v1181_v44 = vadd.f32 %v1979_v35, %v1037_v42  ;;  %v1183_v45 = vadd.f32 %v1979_v35, %v1090_v43  ;;  %v1039_v46 = vpop.f32.mrb[6].mxu1  ;;  %v1092_v47 = vpop.f32.mrb[10].mxu0 }
 0x2ca   : > { %v1200_v48 = vmax.f32 %v1180_v3, 0.0  ;;  %v1202_v49 = vmax.f32 %v1182_v41, 0.0  ;;  %v1185_v50 = vadd.f32 %v1981_v36, %v1039_v46  ;;  %v1187_v51 = vadd.f32 %v1981_v36, %v1092_v47  ;;  %v1041_v52 = vpop.f32.mrb[7].mxu1  ;;  %v1094_v53 = vpop.f32.mrb[11].mxu0 }
 0x2cb   : > { %v1201_v54 = vmax.f32 %v1181_v44, 0.0  ;;  %v1203_v55 = vmax.f32 %v1183_v45, 0.0  ;;  %v1186_v56 = vadd.f32 %v1981_v36, %v1041_v52  ;;  %v1188_v57 = vadd.f32 %v1981_v36, %v1094_v53  ;;  %v1242_v47 = vpop.permute.xlu1 %1241 }
 0x2cc   : > { %v1205_v58 = vmax.f32 %v1185_v50, 0.0  ;;  %v1207_v59 = vmax.f32 %v1187_v51, 0.0  ;;  %v1244_v0 = vmul.f32 %v1995_v60, %v1200_v48  ;;  %v1246_v1 = vmul.f32 %v1995_v60, %v1202_v49 }
 0x2cd   : > { %v1206_v61 = vmax.f32 %v1186_v56, 0.0  ;;  %v1208_v62 = vmax.f32 %v1188_v57, 0.0  ;;  %v1245_v5 = vmul.f32 %v1995_v60, %v1201_v54  ;;  %v1247_v6 = vmul.f32 %v1995_v60, %v1203_v55 }
 0x2ce   : > { %v1249_v2 = vmul.f32 %v1997_v63, %v1205_v58  ;;  %v1251_v4 = vmul.f32 %v1997_v63, %v1207_v59 }
 0x2cf   : > { %v1250_v7 = vmul.f32 %v1997_v63, %v1206_v61  ;;  %v1252_v8 = vmul.f32 %v1997_v63, %v1208_v62  ;;  %v1045_v9 = vpop.f32.mrb[8].mxu1  ;;  %v1098_v10 = vpop.f32.mrb[12].mxu0 }
 0x2d0   : > { %v1190_v11 = vadd.f32 %v1983_v37, %v1045_v9  ;;  %v1264_v12 = vadd.f32 %v1249_v2, %v1244_v0  ;;  %v1192_v13 = vadd.f32 %v1983_v37, %v1098_v10  ;;  %v1282_v14 = vadd.f32 %v1251_v4, %v1246_v1  ;;  %v1047_v15 = vpop.f32.mrb[9].mxu1  ;;  %v1100_v16 = vpop.f32.mrb[13].mxu0 }
 0x2d1   : > { %v1191_v18 = vadd.f32 %v1983_v37, %v1047_v15  ;;  %v1273_v20 = vadd.f32 %v1250_v7, %v1245_v5  ;;  %v1193_v22 = vadd.f32 %v1983_v37, %v1100_v16  ;;  %v1291_v23 = vadd.f32 %v1252_v8, %v1247_v6  ;;  %v1049_v21 = vpop.f32.mrb[10].mxu1  ;;  %v1102_v24 = vpop.f32.mrb[14].mxu0 }
 0x2d2   : > { %v1210_v25 = vmax.f32 %v1190_v11, 0.0  ;;  %v1212_v27 = vmax.f32 %v1192_v13, 0.0  ;;  %v1195_v26 = vadd.f32 %v1985_v38, %v1049_v21  ;;  %v1197_v28 = vadd.f32 %v1985_v38, %v1102_v24  ;;  %v1051_v29 = vpop.f32.mrb[11].mxu1  ;;  %v1104_v30 = vpop.f32.mrb[15].mxu0 }
 0x2d3   : > { %v1211_v32 = vmax.f32 %v1191_v18, 0.0  ;;  %v1213_v33 = vmax.f32 %v1193_v22, 0.0  ;;  %v1196_v34 = vadd.f32 %v1985_v38, %v1051_v29  ;;  %v1198_v39 = vadd.f32 %v1985_v38, %v1104_v30 }
 0x2d4   : > { %v1254_v40 = vmul.f32 %v1237_v31, %v1210_v25  ;;  %v1256_v3 = vmul.f32 %v1237_v31, %v1212_v27  ;;  %v1215_v41 = vmax.f32 %v1195_v26, 0.0  ;;  %v1217_v42 = vmax.f32 %v1197_v28, 0.0  ;;  %v1318_v28 = vpop.permute.xlu0 %1317 }
 0x2d5   : > { %v1255_v43 = vmul.f32 %v1237_v31, %v1211_v32  ;;  %v1257_v44 = vmul.f32 %v1237_v31, %v1213_v33  ;;  %v1216_v45 = vmax.f32 %v1196_v34, 0.0  ;;  %v1218_v46 = vmax.f32 %v1198_v39, 0.0 }
 0x2d6   : > { %v1265_v48 = vadd.f32 %v1264_v12, %v1254_v40  ;;  %v1283_v49 = vadd.f32 %v1282_v14, %v1256_v3  ;;  %v1259_v50 = vmul.f32 %v1242_v47, %v1215_v41  ;;  %v1261_v51 = vmul.f32 %v1242_v47, %v1217_v42 }
 0x2d7   : > { %v1274_v52 = vadd.f32 %v1273_v20, %v1255_v43  ;;  %v1292_v53 = vadd.f32 %v1291_v23, %v1257_v44  ;;  %v1260_v54 = vmul.f32 %v1242_v47, %v1216_v45  ;;  %v1262_v55 = vmul.f32 %v1242_v47, %v1218_v46  ;;  %v1614_v56 = vpop.f32.mrb[12].mxu1 }
 0x2d8   : > { %v1266_v57 = vadd.f32 %v1265_v48, %v1259_v50  ;;  %v1284_v58 = vadd.f32 %v1283_v49, %v1261_v51  ;;  %v1194_v59 = vadd.f32 %v1614_v56, %v1983_v37  ;;  %v1141_v61 = vpop.f32.mrb[13].mxu1  ;;  %v1322_v25 = vsub.s32 0, %v1900_v19 }
 0x2d9   : > { %v1275_v62 = vadd.f32 %v1274_v52, %v1260_v54  ;;  %v1293_v0 = vadd.f32 %v1292_v53, %v1262_v55  ;;  %v1184_v1 = vadd.f32 %v1979_v35, %v1141_v61  ;;  %v1615_v2 = vpop.f32.mrb[14].mxu1 }
 0x2da   : > { %v1267_v4 = vrot.slane %v1266_v57, 4  ;;  %v1285_v5 = vrot.slane %v1284_v58, 4  ;;  %v1214_v6 = vmax.f32 %v1194_v59, 0.0  ;;  %v1199_v7 = vadd.f32 %v1615_v2, %v1985_v38  ;;  %v1144_v8 = vpop.f32.mrb[15].mxu1 }
 0x2db   : > { %v1276_v9 = vrot.slane %v1275_v62, 4  ;;  %v1294_v10 = vrot.slane %v1293_v0, 4  ;;  %v1204_v11 = vmax.f32 %v1184_v1, 0.0  ;;  %v1189_v12 = vadd.f32 %v1981_v36, %v1144_v8 }
 0x2dc   : > { %v1268_v13 = vadd.f32 %v1267_v4, %v1266_v57  ;;  %v1286_v14 = vadd.f32 %v1285_v5, %v1284_v58  ;;  %v1219_v37 = vmax.f32 %v1199_v7, 0.0  ;;  %v1258_v38 = vmul.f32 %v1237_v31, %v1214_v6 }
 0x2dd   : > { %v1277_v15 = vadd.f32 %v1276_v9, %v1275_v62  ;;  %v1295_v16 = vadd.f32 %v1294_v10, %v1293_v0  ;;  %v1248_v18 = vmul.f32 %v1995_v60, %v1204_v11  ;;  %v1209_v35 = vmax.f32 %v1189_v12, 0.0 }
 0x2de   : > { %v1269_v20 = vrot.slane %v1268_v13, 2  ;;  %v1287_v22 = vrot.slane %v1286_v14, 2  ;;  %v1263_v26 = vmul.f32 %v1242_v47, %v1219_v37  ;;  %v1304_v31 = vsel %vm1300_vm6, %v1258_v38, 0.0 }
 0x2df   : > { %v1278_v23 = vrot.slane %v1277_v15, 2  ;;  %v1296_v21 = vrot.slane %v1295_v16, 2  ;;  %v1253_v24 = vmul.f32 %v1997_v63, %v1209_v35  ;;  %v1301_v32 = vsel %vm1300_vm6, %v1248_v18, 0.0 }
 0x2e0   : > { %v1270_v27 = vadd.f32 %v1269_v20, %v1268_v13  ;;  %v1288_v36 = vadd.f32 %v1287_v22, %v1286_v14  ;;  %v1323_v63 = vrot.slane %v1318_v28, %v1322_v25  ;;  %v1306_v46 = vsel %vm1300_vm6, %v1263_v26, 0.0 }
 0x2e1   : > { %v1279_v29 = vadd.f32 %v1278_v23, %v1277_v15  ;;  %v1297_v30 = vadd.f32 %v1296_v21, %v1295_v16  ;;  %v1302_v60 = vsel %vm1300_vm6, %v1253_v24, 0.0  ;;  %v1764_v11 = vmov 1966171168  }
 0x2e2   : > { %v1271_v33 = vrot.slane %v1270_v27, 1  ;;  %v1289_v34 = vrot.slane %v1288_v36, 1  ;;  %v1303_v39 = vadd.f32 %v1302_v60, %v1301_v32  ;;  %v1367_v12 = vunpack.c.l.s4 %v1764_v11 }
 0x2e3   : > { %v1280_v40 = vrot.slane %v1279_v29, 1  ;;  %v1298_v3 = vrot.slane %v1297_v30, 1 }
 0x2e4   : > { %v1272_v41 = vadd.f32 %v1271_v33, %v1270_v27  ;;  %v1290_v42 = vadd.f32 %v1289_v34, %v1288_v36  ;;  %v1305_v43 = vadd.f32 %v1304_v31, %v1303_v39  ;;  %v1368_v13 = vunpack.c.0.s8 %v1367_v12 }
 0x2e5   : > { %v1281_v44 = vadd.f32 %v1280_v40, %v1279_v29  ;;  %v1299_v45 = vadd.f32 %v1298_v3, %v1297_v30 }
 0x2e6   : > { %v1324_v47 = vadd.f32 %v1323_v63, %v1272_v41  ;;  %v1326_v48 = vadd.f32 %v1323_v63, %v1290_v42  ;;  %v1307_v49 = vadd.f32 %v1306_v46, %v1305_v43  ;;  %v1371_v37 = vsub.s32 %v1368_v13, %v1900_v19 }
 0x2e7   : > { %v1325_v50 = vadd.f32 %v1323_v63, %v1281_v44  ;;  %v1327_v51 = vadd.f32 %v1323_v63, %v1299_v45 }
 0x2e8   : > { %v1566_v52 = vmul.f32 -1.442695, %v1324_v47  ;;  %v1568_v53 = vmul.f32 -1.442695, %v1326_v48  ;;  %v1308_v54 = vrot.slane %v1307_v49, 4 }
 0x2e9   : > { %v1567_v55 = vmul.f32 -1.442695, %v1325_v50  ;;  %v1569_v56 = vmul.f32 -1.442695, %v1327_v51 }
 0x2ea   : > { %1699 = vpow2.f32 %v1566_v52  ;;  %v1309_v57 = vadd.f32 %v1308_v54, %v1307_v49 }
 0x2eb   : > { %1701 = vpow2.f32 %v1567_v55 }
 0x2ec   : > { %1703 = vpow2.f32 %v1568_v53  ;;  %v1310_v58 = vrot.slane %v1309_v57, 2 }
 0x2ed   : > { %1705 = vpow2.f32 %v1569_v56 }
 0x2ee   : > { %v1311_v59 = vadd.f32 %v1310_v58, %v1309_v57 }
 0x2f0   : > { %v1312_v61 = vrot.slane %v1311_v59, 1 }
 0x2f2   : > { %v1313_v62 = vadd.f32 %v1312_v61, %v1311_v59 }
 0x2f4   : > { %v1700_v0 = vpop.eup %1699  ;;  %v1328_v1 = vadd.f32 %v1323_v63, %v1313_v62 }
 0x2f5   : > { %v1702_v2 = vpop.eup %1701  ;;  %v1344_v4 = vadd.f32 1.0, %v1700_v0 }
 0x2f6   : > { %v1704_v5 = vpop.eup %1703  ;;  %v1345_v6 = vadd.f32 1.0, %v1702_v2  ;;  %v1570_v9 = vmul.f32 -1.442695, %v1328_v1 }
 0x2f7   : > { %v1706_v7 = vpop.eup %1705  ;;  %v1346_v8 = vadd.f32 1.0, %v1704_v5  ;;  %1707 = vrcp.f32 %v1344_v4 }
 0x2f8   : > { %v1347_v10 = vadd.f32 1.0, %v1706_v7  ;;  %1709 = vrcp.f32 %v1345_v6 }
 0x2f9   : > { %1711 = vrcp.f32 %v1346_v8 }
 0x2fa   : > { %1713 = vrcp.f32 %v1347_v10 }
 0x2fb   : > { %1715 = vpow2.f32 %v1570_v9 }
 0x301   : > { %v1708_v14 = vpop.eup %1707 }
 0x302   : > { %v1710_v15 = vpop.eup %1709 }
 0x303   : > { %v1712_v16 = vpop.eup %1711  ;;  %v1364_v18 = vcombine.low %v1708_v14, %v1710_v15 }
 0x304   : > { %v1714_v35 = vpop.eup %1713 }
 0x305   : > { %v1716_v20 = vpop.eup %1715  ;;  %v1365_v22 = vcombine.low %v1712_v16, %v1714_v35  ;;  %v1372_v23 = vrot.slane %v1364_v18, %v1371_v37 }
 0x306   : > { %v1348_v21 = vadd.f32 1.0, %v1716_v20 }
 0x307   : > { %v1379_v38 = vrot.slane %v1365_v22, %v1371_v37 }
 0x308   : > { %1717 = vrcp.f32 %v1348_v21 }
 0x309   : > { %v1387_v24 = vcombine.low %v1372_v23, %v1379_v38 }
 0x30b   : > { %v1394_v25 = vrot.slane %v1387_v24, %v1371_v37 }
 0x312   : > { %v1718_v27 = vpop.eup %1717 }
 0x313   : > { %v1386_v36 = vrot.slane %v1718_v27, %v1371_v37 }
 0x315   : > { %v1401_v26 = vrot.slane %v1386_v36, %v1371_v37 }
 0x317   : > { %v1402_v19 = vcombine.low %v1394_v25, %v1401_v26 }
 0x319   : > { %1408 = vst.msk [vmem:[%s511_s21] sm:$0x1f] %vm1406_vm7, %v1402_v19 }
 0x31a PF: > { %s24_s27 = sadd.s32 1, %s1757_s27   ;;  %s2061_s22 = sld [smem:[#allocation3_spill]] }
 0x31b   : > { %p21_p7 = scmp.ge.s32.totalorder %s24_s27, 8   ;;  %s2062_s23 = smov %s1749_s25 }
 0x31c   : > { %s2063_s24 = smov %s1753_s26  ;;  %s2064_s25 = smov %s2067_s9 }
 0x31d   :  { %23 = sbr.rel (!%p21_p7) target bundleno = 3 (0x3), region = 104 }
 0x320   : > { %s2065_s26 = smov %s2061_s22 }

</bundles_post_ra>
